<compile_context>
chip_gen: v6e
topology: v6e:2x2x1
jax: 0.10.0
libtpu: 0.0.40
codegen_flags: <defaults>
</compile_context>

<pallas_src>
import functools

import jax
import jax.numpy as jnp
import numpy as np
from jax.experimental import pallas as pl
from jax.experimental.pallas import tpu as pltpu

C_PAD = 128  # lane-dense logits width (sliced back to C in the wrapper)


def text_att_birnn_kernel(
    x_ref,          # (T*B, E)    time-major flattened embedded input (row = t*B + b)
    wih_comb_ref,   # (E, 8H)     [wih_f | wih_b]   (gate order i,f,g,o per direction)
    b_comb_ref,     # (1, 8H)     [b_f | b_b]       (b_ih + b_hh per direction)
    whh_f_ref,      # (H, 4H)     forward  hidden-to-hidden weights
    whh_b_ref,      # (H, 4H)     backward hidden-to-hidden weights
    w_omega_ref,    # (2H, A)     attention projection
    u_omega_ref,    # (1, A)      attention context vector (row layout)
    w_label_ref,    # (2H, C_PAD) classifier weight, columns padded to 128
    b_label_ref,    # (1, C_PAD)  classifier bias, padded
    logits_ref,     # out: (B, C_PAD)
    gin_ref,        # scratch: (T*B, 8H) hoisted input-to-hidden gate pre-activations
    lstm_ref,       # scratch: (T*B, 2H) combined [fwd | bwd] hidden states
    *, T, B, H,
):
    H4 = 4 * H

    # ---- hoisted input-to-hidden projection: one big MXU matmul covers both
    # directions and all time steps; biases folded in so the loop has no
    # per-step bias broadcast. ----
    gin_ref[...] = (
        jnp.dot(x_ref[...], wih_comb_ref[...], preferred_element_type=jnp.float32)
        + b_comb_ref[...]
    )

    whh_f = whh_f_ref[...]
    whh_b = whh_b_ref[...]

    def lstm_gates(gates, c):
        # one full-width sigmoid + one full-width tanh (EUP), then static lane
        # slices of the already-activated values.
        a = jax.nn.sigmoid(gates)
        t = jnp.tanh(gates)
        i = a[:, 0 * H:1 * H]
        f = a[:, 1 * H:2 * H]
        g = t[:, 2 * H:3 * H]
        o = a[:, 3 * H:4 * H]
        c_new = f * c + i * g
        h_new = o * jnp.tanh(c_new)
        return h_new, c_new

    hf = jnp.zeros((B, H), jnp.float32)   # h_0 = c_0 = 0, as in the module
    cf = jnp.zeros((B, H), jnp.float32)
    hb = jnp.zeros((B, H), jnp.float32)
    cb = jnp.zeros((B, H), jnp.float32)

    # ---- statically-unrolled bidirectional recurrence: only h @ whh remains
    # on the serial critical path. ----
    for s in range(T):
        rt = T - 1 - s
        rf = s * B          # forward rows for time s
        rb = rt * B         # backward rows for time T-1-s
        gates_f = (jnp.dot(hf, whh_f, preferred_element_type=jnp.float32)
                   + gin_ref[rf:rf + B, 0:H4])
        gates_b = (jnp.dot(hb, whh_b, preferred_element_type=jnp.float32)
                   + gin_ref[rb:rb + B, H4:2 * H4])
        hf, cf = lstm_gates(gates_f, cf)
        hb, cb = lstm_gates(gates_b, cb)
        # write both directions straight into the combined output scratch
        # (no concatenate / reshape materialization later).
        lstm_ref[rf:rf + B, 0:H] = hf
        lstm_ref[rb:rb + B, H:2 * H] = hb

    # ---- attention: mirrors TextAttBiRNN.att() exactly, including the
    # (T*B, 1) -> (B, T) flat reshape quirk of the original module. ----
    lstm2d = lstm_ref[...]                                            # (T*B, 2H)
    attn_tanh = jnp.tanh(jnp.dot(lstm2d, w_omega_ref[...],
                                 preferred_element_type=jnp.float32))  # (T*B, A)
    # u_omega projection as elementwise multiply + lane reduction (no N=1 matmul).
    scores = jnp.sum(attn_tanh * u_omega_ref[...], axis=-1, keepdims=True)  # (T*B, 1)
    scores_bt = scores.reshape(B, T)            # bug-compatible flat remap (t*B+b -> i*T+j)
    m = jnp.max(scores_bt, axis=1, keepdims=True)
    e = jnp.exp(scores_bt - m)                  # stabilized; identical alphas
    alphas = e / jnp.sum(e, axis=1, keepdims=True)                    # (B, T)

    # att_output[b] = sum_t lstm_output[t, b, :] * alphas[b, t]
    alphas_t = jnp.swapaxes(alphas, 0, 1)                             # (T, B)
    weighted = lstm2d.reshape(T, B, 2 * H) * alphas_t[:, :, None]
    att = jnp.sum(weighted, axis=0)                                   # (B, 2H)

    logits_ref[...] = (jnp.dot(att, w_label_ref[...],
                               preferred_element_type=jnp.float32)
                       + b_label_ref[...])                            # (B, C_PAD)


def text_att_birnn_forward(tokens, params):
    """tokens: (B, T) int32.  Returns logits (B, C)."""
    emb = params["embedding"]
    # TODO(synk): fold the embedding gather into the kernel (scalar-prefetched
    # token ids + pl.Element row-gather BlockSpec) to remove the (T,B,E) HBM
    # round trip at production sizes.
    x = emb[tokens]                                       # (B, T, E)
    x = jnp.transpose(x, (1, 0, 2)).astype(jnp.float32)   # (T, B, E) time-major
    T, B, E = x.shape
    x2d = x.reshape(T * B, E)                             # row = t*B + b

    H = params["whh_f"].shape[0]
    C = params["w_label"].shape[1]

    wih_comb = jnp.concatenate([params["wih_f"], params["wih_b"]], axis=1)   # (E, 8H)
    b_comb = jnp.concatenate([params["b_f"], params["b_b"]], axis=1)         # (1, 8H)
    w_label_pad = jnp.zeros((2 * H, C_PAD), jnp.float32).at[:, :C].set(params["w_label"])
    b_label_pad = jnp.zeros((1, C_PAD), jnp.float32).at[:, :C].set(params["b_label"])

    kernel = functools.partial(text_att_birnn_kernel, T=T, B=B, H=H)
    vmem = pl.BlockSpec(memory_space=pltpu.MemorySpace.VMEM)
    args = (x2d, wih_comb, b_comb, params["whh_f"], params["whh_b"],
            params["w_omega"], params["u_omega"], w_label_pad, b_label_pad)

    # TODO(synk): the att() flat reshape couples batch and time (flat index
    # t*B+b read back as i*T+j), so the batch cannot be split across v7x's two
    # TensorCores without changing the module's semantics.
    logits_pad = pl.pallas_call(
        kernel,
        out_shape=jax.ShapeDtypeStruct((B, C_PAD), jnp.float32),
        in_specs=[vmem] * len(args),
        out_specs=vmem,
        scratch_shapes=[
            pltpu.VMEM((T * B, 8 * H), jnp.float32),   # hoisted gate pre-activations
            pltpu.VMEM((T * B, 2 * H), jnp.float32),   # combined fwd/bwd hidden states
        ],
    )(*args)
    return logits_pad[:, :C]


def init_params(key, V, E, H, A, C):
    ks = jax.random.split(key, 12)
    k_lstm = 1.0 / np.sqrt(H)

    def u(k, shape, lim):
        return jax.random.uniform(k, shape, jnp.float32, -lim, lim)

    emb = jax.random.uniform(ks[0], (V, E), jnp.float32, -1.0, 1.0)
    emb = emb.at[0].set(0.0)                     # padding_idx=0

    # PyTorch LSTM parameter shapes: weight_ih (4H, E), weight_hh (4H, H),
    # biases (4H,); stored transposed for row-major matmul in the kernel.
    wih_f = u(ks[1], (4 * H, E), k_lstm).T
    whh_f = u(ks[2], (4 * H, H), k_lstm).T
    b_f = (u(ks[3], (4 * H,), k_lstm) + u(ks[4], (4 * H,), k_lstm)).reshape(1, 4 * H)
    wih_b = u(ks[5], (4 * H, E), k_lstm).T
    whh_b = u(ks[6], (4 * H, H), k_lstm).T
    b_b = (u(ks[7], (4 * H,), k_lstm) + u(ks[8], (4 * H,), k_lstm)).reshape(1, 4 * H)

    # NOTE: the module initializes w_omega/u_omega to zeros (untrained Variables);
    # small random values are used here so the attention path is actually exercised.
    w_omega = 0.1 * jax.random.normal(ks[9], (2 * H, A), jnp.float32)
    u_omega = 0.1 * jax.random.normal(ks[10], (1, A), jnp.float32)

    k_lab = 1.0 / np.sqrt(2 * H)
    w_label = u(ks[11], (C, 2 * H), k_lab).T     # (2H, C)
    b_label = jnp.zeros((1, C), jnp.float32)

    return dict(embedding=emb,
                wih_f=wih_f, whh_f=whh_f, b_f=b_f,
                wih_b=wih_b, whh_b=whh_b, b_b=b_b,
                w_omega=w_omega, u_omega=u_omega,
                w_label=w_label, b_label=b_label)


def reference_forward(tokens, params):
    """Pure-JAX reference mirroring the PyTorch forward()."""
    emb = params["embedding"]
    x = jnp.transpose(emb[tokens], (1, 0, 2)).astype(jnp.float32)  # (T, B, E)
    T, B, _E = x.shape
    H = params["whh_f"].shape[0]

    def run_dir(xs, wih, whh, b):
        h = jnp.zeros((B, H), jnp.float32)
        c = jnp.zeros((B, H), jnp.float32)
        outs = []
        for t in range(xs.shape[0]):
            gates = xs[t] @ wih + h @ whh + b
            i = jax.nn.sigmoid(gates[:, :H])
            f = jax.nn.sigmoid(gates[:, H:2 * H])
            g = jnp.tanh(gates[:, 2 * H:3 * H])
            o = jax.nn.sigmoid(gates[:, 3 * H:])
            c = f * c + i * g
            h = o * jnp.tanh(c)
            outs.append(h)
        return jnp.stack(outs)

    out_f = run_dir(x, params["wih_f"], params["whh_f"], params["b_f"])
    out_b = run_dir(x[::-1], params["wih_b"], params["whh_b"], params["b_b"])[::-1]
    lstm_out = jnp.concatenate([out_f, out_b], axis=-1)   # (T, B, 2H)

    out2d = lstm_out.reshape(T * B, 2 * H)
    attn_tanh = jnp.tanh(out2d @ params["w_omega"])
    attn_hidden = attn_tanh @ params["u_omega"].reshape(-1, 1)   # (T*B, 1)
    exps = jnp.exp(attn_hidden).reshape(B, T)
    alphas = exps / jnp.sum(exps, axis=1, keepdims=True)
    state = jnp.transpose(lstm_out, (1, 0, 2))
    att = jnp.sum(state * alphas[:, :, None], axis=1)
    return att @ params["w_label"] + params["b_label"]


if __name__ == "__main__":
    # small shapes consistent with the module's forward:
    V, E, H, A, T, B, C = 50, 32, 32, 32, 8, 8, 3
    key = jax.random.PRNGKey(0)
    params = init_params(key, V, E, H, A, C)
    tokens = jax.random.randint(jax.random.fold_in(key, 123), (B, T), 0, V)

    logits = text_att_birnn_forward(tokens, params)
    jax.block_until_ready(logits)
    assert logits.shape == (B, C)

    ref = reference_forward(tokens, params)
    np.testing.assert_allclose(np.asarray(logits), np.asarray(ref),
                               rtol=1e-4, atol=1e-4)
    print("KERNEL_OK")
</pallas_src>

<mosaic_0001>
module attributes {stable_mosaic.version = 11 : i64} {
  func.func @text_att_birnn_kernel(%arg0: memref<64x32xf32, #tpu.memory_space<vmem>>, %arg1: memref<32x256xf32, #tpu.memory_space<vmem>>, %arg2: memref<1x256xf32, #tpu.memory_space<vmem>>, %arg3: memref<32x128xf32, #tpu.memory_space<vmem>>, %arg4: memref<32x128xf32, #tpu.memory_space<vmem>>, %arg5: memref<64x32xf32, #tpu.memory_space<vmem>>, %arg6: memref<1x32xf32, #tpu.memory_space<vmem>>, %arg7: memref<64x128xf32, #tpu.memory_space<vmem>>, %arg8: memref<1x128xf32, #tpu.memory_space<vmem>>, %arg9: memref<8x128xf32, #tpu.memory_space<vmem>>, %arg10: memref<64x256xf32, #tpu.memory_space<vmem>>, %arg11: memref<64x64xf32, #tpu.memory_space<vmem>>) attributes {dimension_semantics = [], scalar_prefetch = 0 : i64, scratch_operands = 2 : i64, tpu.core_type = #tpu.core_type<tc>} {
    %c0 = arith.constant 0 : index
    %c0_0 = arith.constant 0 : index
    %0 = vector.load %arg0[%c0, %c0_0] : memref<64x32xf32, #tpu.memory_space<vmem>>, vector<64x32xf32>
    %c0_1 = arith.constant 0 : index
    %c0_2 = arith.constant 0 : index
    %1 = vector.load %arg1[%c0_1, %c0_2] : memref<32x256xf32, #tpu.memory_space<vmem>>, vector<32x256xf32>
    %cst = arith.constant dense<0.000000e+00> : vector<64x256xf32>
    %2 = tpu.matmul %0, %1, %cst {dimension_numbers = #tpu.dot_dimension_numbers<[1], [0], [0], [1], [0, 0, 1, 1], [], []>} : vector<64x32xf32>, vector<32x256xf32>, vector<64x256xf32> -> vector<64x256xf32>
    %c0_3 = arith.constant 0 : index
    %c0_4 = arith.constant 0 : index
    %3 = vector.load %arg2[%c0_3, %c0_4] : memref<1x256xf32, #tpu.memory_space<vmem>>, vector<1x256xf32>
    %4 = vector.broadcast %3 : vector<1x256xf32> to vector<64x256xf32>
    %5 = arith.addf %2, %4 : vector<64x256xf32>
    %c0_5 = arith.constant 0 : index
    %c0_6 = arith.constant 0 : index
    %6 = vector.load %arg10[%c0_5, %c0_6] : memref<64x256xf32, #tpu.memory_space<vmem>>, vector<64x256xf32>
    tpu.vector_store %arg10[%c0_5, %c0_6], %5 {strides = array<i32>} : memref<64x256xf32, #tpu.memory_space<vmem>>, vector<64x256xf32>,
    %c0_7 = arith.constant 0 : index
    %c0_8 = arith.constant 0 : index
    %7 = vector.load %arg3[%c0_7, %c0_8] : memref<32x128xf32, #tpu.memory_space<vmem>>, vector<32x128xf32>
    %c0_9 = arith.constant 0 : index
    %c0_10 = arith.constant 0 : index
    %8 = vector.load %arg4[%c0_9, %c0_10] : memref<32x128xf32, #tpu.memory_space<vmem>>, vector<32x128xf32>
    %cst_11 = arith.constant 0.000000e+00 : f32
    %9 = vector.broadcast %cst_11 : f32 to vector<8x32xf32>
    %cst_12 = arith.constant 0.000000e+00 : f32
    %10 = vector.broadcast %cst_12 : f32 to vector<8x32xf32>
    %cst_13 = arith.constant 0.000000e+00 : f32
    %11 = vector.broadcast %cst_13 : f32 to vector<8x32xf32>
    %cst_14 = arith.constant 0.000000e+00 : f32
    %12 = vector.broadcast %cst_14 : f32 to vector<8x32xf32>
    %cst_15 = arith.constant dense<0.000000e+00> : vector<8x128xf32>
    %13 = tpu.matmul %9, %7, %cst_15 {dimension_numbers = #tpu.dot_dimension_numbers<[1], [0], [0], [1], [0, 0, 1, 1], [], []>} : vector<8x32xf32>, vector<32x128xf32>, vector<8x128xf32> -> vector<8x128xf32>
    %c0_16 = arith.constant 0 : index
    %c0_17 = arith.constant 0 : index
    %14 = vector.load %arg10[%c0_16, %c0_17] : memref<64x256xf32, #tpu.memory_space<vmem>>, vector<8x128xf32>
    %15 = arith.addf %13, %14 : vector<8x128xf32>
    %cst_18 = arith.constant dense<0.000000e+00> : vector<8x128xf32>
    %16 = tpu.matmul %11, %8, %cst_18 {dimension_numbers = #tpu.dot_dimension_numbers<[1], [0], [0], [1], [0, 0, 1, 1], [], []>} : vector<8x32xf32>, vector<32x128xf32>, vector<8x128xf32> -> vector<8x128xf32>
    %c56 = arith.constant 56 : index
    %c128 = arith.constant 128 : index
    %17 = vector.load %arg10[%c56, %c128] : memref<64x256xf32, #tpu.memory_space<vmem>>, vector<8x128xf32>
    %18 = arith.addf %16, %17 : vector<8x128xf32>
    %19 = arith.negf %15 : vector<8x128xf32>
    %20 = math.exp %19 : vector<8x128xf32>
    %cst_19 = arith.constant 1.000000e+00 : f32
    %21 = vector.broadcast %cst_19 : f32 to vector<8x128xf32>
    %22 = arith.addf %21, %20 : vector<8x128xf32>
    %23 = arith.divf %21, %22 : vector<8x128xf32>
    %24 = math.tanh %15 : vector<8x128xf32>
    %25 = vector.extract_strided_slice %23 {offsets = [0, 0], sizes = [8, 32], strides = [1, 1]} : vector<8x128xf32> to vector<8x32xf32>
    %26 = vector.extract_strided_slice %23 {offsets = [0, 32], sizes = [8, 32], strides = [1, 1]} : vector<8x128xf32> to vector<8x32xf32>
    %27 = vector.extract_strided_slice %24 {offsets = [0, 64], sizes = [8, 32], strides = [1, 1]} : vector<8x128xf32> to vector<8x32xf32>
    %28 = vector.extract_strided_slice %23 {offsets = [0, 96], sizes = [8, 32], strides = [1, 1]} : vector<8x128xf32> to vector<8x32xf32>
    %29 = arith.mulf %26, %10 : vector<8x32xf32>
    %30 = arith.mulf %25, %27 : vector<8x32xf32>
    %31 = arith.addf %29, %30 : vector<8x32xf32>
    %32 = math.tanh %31 : vector<8x32xf32>
    %33 = arith.mulf %28, %32 : vector<8x32xf32>
    %34 = arith.negf %18 : vector<8x128xf32>
    %35 = math.exp %34 : vector<8x128xf32>
    %cst_20 = arith.constant 1.000000e+00 : f32
    %36 = vector.broadcast %cst_20 : f32 to vector<8x128xf32>
    %37 = arith.addf %36, %35 : vector<8x128xf32>
    %38 = arith.divf %36, %37 : vector<8x128xf32>
    %39 = math.tanh %18 : vector<8x128xf32>
    %40 = vector.extract_strided_slice %38 {offsets = [0, 0], sizes = [8, 32], strides = [1, 1]} : vector<8x128xf32> to vector<8x32xf32>
    %41 = vector.extract_strided_slice %38 {offsets = [0, 32], sizes = [8, 32], strides = [1, 1]} : vector<8x128xf32> to vector<8x32xf32>
    %42 = vector.extract_strided_slice %39 {offsets = [0, 64], sizes = [8, 32], strides = [1, 1]} : vector<8x128xf32> to vector<8x32xf32>
    %43 = vector.extract_strided_slice %38 {offsets = [0, 96], sizes = [8, 32], strides = [1, 1]} : vector<8x128xf32> to vector<8x32xf32>
    %44 = arith.mulf %41, %12 : vector<8x32xf32>
    %45 = arith.mulf %40, %42 : vector<8x32xf32>
    %46 = arith.addf %44, %45 : vector<8x32xf32>
    %47 = math.tanh %46 : vector<8x32xf32>
    %48 = arith.mulf %43, %47 : vector<8x32xf32>
    %c0_21 = arith.constant 0 : index
    %c0_22 = arith.constant 0 : index
    %49 = vector.load %arg11[%c0_21, %c0_22] : memref<64x64xf32, #tpu.memory_space<vmem>>, vector<8x32xf32>
    tpu.vector_store %arg11[%c0_21, %c0_22], %33 {strides = array<i32>} : memref<64x64xf32, #tpu.memory_space<vmem>>, vector<8x32xf32>,
    %c56_23 = arith.constant 56 : index
    %c32 = arith.constant 32 : index
    %50 = vector.load %arg11[%c56_23, %c32] : memref<64x64xf32, #tpu.memory_space<vmem>>, vector<8x32xf32>
    tpu.vector_store %arg11[%c56_23, %c32], %48 {strides = array<i32>} : memref<64x64xf32, #tpu.memory_space<vmem>>, vector<8x32xf32>,
    %cst_24 = arith.constant dense<0.000000e+00> : vector<8x128xf32>
    %51 = tpu.matmul %33, %7, %cst_24 {dimension_numbers = #tpu.dot_dimension_numbers<[1], [0], [0], [1], [0, 0, 1, 1], [], []>} : vector<8x32xf32>, vector<32x128xf32>, vector<8x128xf32> -> vector<8x128xf32>
    %c8 = arith.constant 8 : index
    %c0_25 = arith.constant 0 : index
    %52 = vector.load %arg10[%c8, %c0_25] : memref<64x256xf32, #tpu.memory_space<vmem>>, vector<8x128xf32>
    %53 = arith.addf %51, %52 : vector<8x128xf32>
    %cst_26 = arith.constant dense<0.000000e+00> : vector<8x128xf32>
    %54 = tpu.matmul %48, %8, %cst_26 {dimension_numbers = #tpu.dot_dimension_numbers<[1], [0], [0], [1], [0, 0, 1, 1], [], []>} : vector<8x32xf32>, vector<32x128xf32>, vector<8x128xf32> -> vector<8x128xf32>
    %c48 = arith.constant 48 : index
    %c128_27 = arith.constant 128 : index
    %55 = vector.load %arg10[%c48, %c128_27] : memref<64x256xf32, #tpu.memory_space<vmem>>, vector<8x128xf32>
    %56 = arith.addf %54, %55 : vector<8x128xf32>
    %57 = arith.negf %53 : vector<8x128xf32>
    %58 = math.exp %57 : vector<8x128xf32>
    %cst_28 = arith.constant 1.000000e+00 : f32
    %59 = vector.broadcast %cst_28 : f32 to vector<8x128xf32>
    %60 = arith.addf %59, %58 : vector<8x128xf32>
    %61 = arith.divf %59, %60 : vector<8x128xf32>
    %62 = math.tanh %53 : vector<8x128xf32>
    %63 = vector.extract_strided_slice %61 {offsets = [0, 0], sizes = [8, 32], strides = [1, 1]} : vector<8x128xf32> to vector<8x32xf32>
    %64 = vector.extract_strided_slice %61 {offsets = [0, 32], sizes = [8, 32], strides = [1, 1]} : vector<8x128xf32> to vector<8x32xf32>
    %65 = vector.extract_strided_slice %62 {offsets = [0, 64], sizes = [8, 32], strides = [1, 1]} : vector<8x128xf32> to vector<8x32xf32>
    %66 = vector.extract_strided_slice %61 {offsets = [0, 96], sizes = [8, 32], strides = [1, 1]} : vector<8x128xf32> to vector<8x32xf32>
    %67 = arith.mulf %64, %31 : vector<8x32xf32>
    %68 = arith.mulf %63, %65 : vector<8x32xf32>
    %69 = arith.addf %67, %68 : vector<8x32xf32>
    %70 = math.tanh %69 : vector<8x32xf32>
    %71 = arith.mulf %66, %70 : vector<8x32xf32>
    %72 = arith.negf %56 : vector<8x128xf32>
    %73 = math.exp %72 : vector<8x128xf32>
    %cst_29 = arith.constant 1.000000e+00 : f32
    %74 = vector.broadcast %cst_29 : f32 to vector<8x128xf32>
    %75 = arith.addf %74, %73 : vector<8x128xf32>
    %76 = arith.divf %74, %75 : vector<8x128xf32>
    %77 = math.tanh %56 : vector<8x128xf32>
    %78 = vector.extract_strided_slice %76 {offsets = [0, 0], sizes = [8, 32], strides = [1, 1]} : vector<8x128xf32> to vector<8x32xf32>
    %79 = vector.extract_strided_slice %76 {offsets = [0, 32], sizes = [8, 32], strides = [1, 1]} : vector<8x128xf32> to vector<8x32xf32>
    %80 = vector.extract_strided_slice %77 {offsets = [0, 64], sizes = [8, 32], strides = [1, 1]} : vector<8x128xf32> to vector<8x32xf32>
    %81 = vector.extract_strided_slice %76 {offsets = [0, 96], sizes = [8, 32], strides = [1, 1]} : vector<8x128xf32> to vector<8x32xf32>
    %82 = arith.mulf %79, %46 : vector<8x32xf32>
    %83 = arith.mulf %78, %80 : vector<8x32xf32>
    %84 = arith.addf %82, %83 : vector<8x32xf32>
    %85 = math.tanh %84 : vector<8x32xf32>
    %86 = arith.mulf %81, %85 : vector<8x32xf32>
    %c8_30 = arith.constant 8 : index
    %c0_31 = arith.constant 0 : index
    %87 = vector.load %arg11[%c8_30, %c0_31] : memref<64x64xf32, #tpu.memory_space<vmem>>, vector<8x32xf32>
    tpu.vector_store %arg11[%c8_30, %c0_31], %71 {strides = array<i32>} : memref<64x64xf32, #tpu.memory_space<vmem>>, vector<8x32xf32>,
    %c48_32 = arith.constant 48 : index
    %c32_33 = arith.constant 32 : index
    %88 = vector.load %arg11[%c48_32, %c32_33] : memref<64x64xf32, #tpu.memory_space<vmem>>, vector<8x32xf32>
    tpu.vector_store %arg11[%c48_32, %c32_33], %86 {strides = array<i32>} : memref<64x64xf32, #tpu.memory_space<vmem>>, vector<8x32xf32>,
    %cst_34 = arith.constant dense<0.000000e+00> : vector<8x128xf32>
    %89 = tpu.matmul %71, %7, %cst_34 {dimension_numbers = #tpu.dot_dimension_numbers<[1], [0], [0], [1], [0, 0, 1, 1], [], []>} : vector<8x32xf32>, vector<32x128xf32>, vector<8x128xf32> -> vector<8x128xf32>
    %c16 = arith.constant 16 : index
    %c0_35 = arith.constant 0 : index
    %90 = vector.load %arg10[%c16, %c0_35] : memref<64x256xf32, #tpu.memory_space<vmem>>, vector<8x128xf32>
    %91 = arith.addf %89, %90 : vector<8x128xf32>
    %cst_36 = arith.constant dense<0.000000e+00> : vector<8x128xf32>
    %92 = tpu.matmul %86, %8, %cst_36 {dimension_numbers = #tpu.dot_dimension_numbers<[1], [0], [0], [1], [0, 0, 1, 1], [], []>} : vector<8x32xf32>, vector<32x128xf32>, vector<8x128xf32> -> vector<8x128xf32>
    %c40 = arith.constant 40 : index
    %c128_37 = arith.constant 128 : index
    %93 = vector.load %arg10[%c40, %c128_37] : memref<64x256xf32, #tpu.memory_space<vmem>>, vector<8x128xf32>
    %94 = arith.addf %92, %93 : vector<8x128xf32>
    %95 = arith.negf %91 : vector<8x128xf32>
    %96 = math.exp %95 : vector<8x128xf32>
    %cst_38 = arith.constant 1.000000e+00 : f32
    %97 = vector.broadcast %cst_38 : f32 to vector<8x128xf32>
    %98 = arith.addf %97, %96 : vector<8x128xf32>
    %99 = arith.divf %97, %98 : vector<8x128xf32>
    %100 = math.tanh %91 : vector<8x128xf32>
    %101 = vector.extract_strided_slice %99 {offsets = [0, 0], sizes = [8, 32], strides = [1, 1]} : vector<8x128xf32> to vector<8x32xf32>
    %102 = vector.extract_strided_slice %99 {offsets = [0, 32], sizes = [8, 32], strides = [1, 1]} : vector<8x128xf32> to vector<8x32xf32>
    %103 = vector.extract_strided_slice %100 {offsets = [0, 64], sizes = [8, 32], strides = [1, 1]} : vector<8x128xf32> to vector<8x32xf32>
    %104 = vector.extract_strided_slice %99 {offsets = [0, 96], sizes = [8, 32], strides = [1, 1]} : vector<8x128xf32> to vector<8x32xf32>
    %105 = arith.mulf %102, %69 : vector<8x32xf32>
    %106 = arith.mulf %101, %103 : vector<8x32xf32>
    %107 = arith.addf %105, %106 : vector<8x32xf32>
    %108 = math.tanh %107 : vector<8x32xf32>
    %109 = arith.mulf %104, %108 : vector<8x32xf32>
    %110 = arith.negf %94 : vector<8x128xf32>
    %111 = math.exp %110 : vector<8x128xf32>
    %cst_39 = arith.constant 1.000000e+00 : f32
    %112 = vector.broadcast %cst_39 : f32 to vector<8x128xf32>
    %113 = arith.addf %112, %111 : vector<8x128xf32>
    %114 = arith.divf %112, %113 : vector<8x128xf32>
    %115 = math.tanh %94 : vector<8x128xf32>
    %116 = vector.extract_strided_slice %114 {offsets = [0, 0], sizes = [8, 32], strides = [1, 1]} : vector<8x128xf32> to vector<8x32xf32>
    %117 = vector.extract_strided_slice %114 {offsets = [0, 32], sizes = [8, 32], strides = [1, 1]} : vector<8x128xf32> to vector<8x32xf32>
    %118 = vector.extract_strided_slice %115 {offsets = [0, 64], sizes = [8, 32], strides = [1, 1]} : vector<8x128xf32> to vector<8x32xf32>
    %119 = vector.extract_strided_slice %114 {offsets = [0, 96], sizes = [8, 32], strides = [1, 1]} : vector<8x128xf32> to vector<8x32xf32>
    %120 = arith.mulf %117, %84 : vector<8x32xf32>
    %121 = arith.mulf %116, %118 : vector<8x32xf32>
    %122 = arith.addf %120, %121 : vector<8x32xf32>
    %123 = math.tanh %122 : vector<8x32xf32>
    %124 = arith.mulf %119, %123 : vector<8x32xf32>
    %c16_40 = arith.constant 16 : index
    %c0_41 = arith.constant 0 : index
    %125 = vector.load %arg11[%c16_40, %c0_41] : memref<64x64xf32, #tpu.memory_space<vmem>>, vector<8x32xf32>
    tpu.vector_store %arg11[%c16_40, %c0_41], %109 {strides = array<i32>} : memref<64x64xf32, #tpu.memory_space<vmem>>, vector<8x32xf32>,
    %c40_42 = arith.constant 40 : index
    %c32_43 = arith.constant 32 : index
    %126 = vector.load %arg11[%c40_42, %c32_43] : memref<64x64xf32, #tpu.memory_space<vmem>>, vector<8x32xf32>
    tpu.vector_store %arg11[%c40_42, %c32_43], %124 {strides = array<i32>} : memref<64x64xf32, #tpu.memory_space<vmem>>, vector<8x32xf32>,
    %cst_44 = arith.constant dense<0.000000e+00> : vector<8x128xf32>
    %127 = tpu.matmul %109, %7, %cst_44 {dimension_numbers = #tpu.dot_dimension_numbers<[1], [0], [0], [1], [0, 0, 1, 1], [], []>} : vector<8x32xf32>, vector<32x128xf32>, vector<8x128xf32> -> vector<8x128xf32>
    %c24 = arith.constant 24 : index
    %c0_45 = arith.constant 0 : index
    %128 = vector.load %arg10[%c24, %c0_45] : memref<64x256xf32, #tpu.memory_space<vmem>>, vector<8x128xf32>
    %129 = arith.addf %127, %128 : vector<8x128xf32>
    %cst_46 = arith.constant dense<0.000000e+00> : vector<8x128xf32>
    %130 = tpu.matmul %124, %8, %cst_46 {dimension_numbers = #tpu.dot_dimension_numbers<[1], [0], [0], [1], [0, 0, 1, 1], [], []>} : vector<8x32xf32>, vector<32x128xf32>, vector<8x128xf32> -> vector<8x128xf32>
    %c32_47 = arith.constant 32 : index
    %c128_48 = arith.constant 128 : index
    %131 = vector.load %arg10[%c32_47, %c128_48] : memref<64x256xf32, #tpu.memory_space<vmem>>, vector<8x128xf32>
    %132 = arith.addf %130, %131 : vector<8x128xf32>
    %133 = arith.negf %129 : vector<8x128xf32>
    %134 = math.exp %133 : vector<8x128xf32>
    %cst_49 = arith.constant 1.000000e+00 : f32
    %135 = vector.broadcast %cst_49 : f32 to vector<8x128xf32>
    %136 = arith.addf %135, %134 : vector<8x128xf32>
    %137 = arith.divf %135, %136 : vector<8x128xf32>
    %138 = math.tanh %129 : vector<8x128xf32>
    %139 = vector.extract_strided_slice %137 {offsets = [0, 0], sizes = [8, 32], strides = [1, 1]} : vector<8x128xf32> to vector<8x32xf32>
    %140 = vector.extract_strided_slice %137 {offsets = [0, 32], sizes = [8, 32], strides = [1, 1]} : vector<8x128xf32> to vector<8x32xf32>
    %141 = vector.extract_strided_slice %138 {offsets = [0, 64], sizes = [8, 32], strides = [1, 1]} : vector<8x128xf32> to vector<8x32xf32>
    %142 = vector.extract_strided_slice %137 {offsets = [0, 96], sizes = [8, 32], strides = [1, 1]} : vector<8x128xf32> to vector<8x32xf32>
    %143 = arith.mulf %140, %107 : vector<8x32xf32>
    %144 = arith.mulf %139, %141 : vector<8x32xf32>
    %145 = arith.addf %143, %144 : vector<8x32xf32>
    %146 = math.tanh %145 : vector<8x32xf32>
    %147 = arith.mulf %142, %146 : vector<8x32xf32>
    %148 = arith.negf %132 : vector<8x128xf32>
    %149 = math.exp %148 : vector<8x128xf32>
    %cst_50 = arith.constant 1.000000e+00 : f32
    %150 = vector.broadcast %cst_50 : f32 to vector<8x128xf32>
    %151 = arith.addf %150, %149 : vector<8x128xf32>
    %152 = arith.divf %150, %151 : vector<8x128xf32>
    %153 = math.tanh %132 : vector<8x128xf32>
    %154 = vector.extract_strided_slice %152 {offsets = [0, 0], sizes = [8, 32], strides = [1, 1]} : vector<8x128xf32> to vector<8x32xf32>
    %155 = vector.extract_strided_slice %152 {offsets = [0, 32], sizes = [8, 32], strides = [1, 1]} : vector<8x128xf32> to vector<8x32xf32>
    %156 = vector.extract_strided_slice %153 {offsets = [0, 64], sizes = [8, 32], strides = [1, 1]} : vector<8x128xf32> to vector<8x32xf32>
    %157 = vector.extract_strided_slice %152 {offsets = [0, 96], sizes = [8, 32], strides = [1, 1]} : vector<8x128xf32> to vector<8x32xf32>
    %158 = arith.mulf %155, %122 : vector<8x32xf32>
    %159 = arith.mulf %154, %156 : vector<8x32xf32>
    %160 = arith.addf %158, %159 : vector<8x32xf32>
    %161 = math.tanh %160 : vector<8x32xf32>
    %162 = arith.mulf %157, %161 : vector<8x32xf32>
    %c24_51 = arith.constant 24 : index
    %c0_52 = arith.constant 0 : index
    %163 = vector.load %arg11[%c24_51, %c0_52] : memref<64x64xf32, #tpu.memory_space<vmem>>, vector<8x32xf32>
    tpu.vector_store %arg11[%c24_51, %c0_52], %147 {strides = array<i32>} : memref<64x64xf32, #tpu.memory_space<vmem>>, vector<8x32xf32>,
    %c32_53 = arith.constant 32 : index
    %c32_54 = arith.constant 32 : index
    %164 = vector.load %arg11[%c32_53, %c32_54] : memref<64x64xf32, #tpu.memory_space<vmem>>, vector<8x32xf32>
    tpu.vector_store %arg11[%c32_53, %c32_54], %162 {strides = array<i32>} : memref<64x64xf32, #tpu.memory_space<vmem>>, vector<8x32xf32>,
    %cst_55 = arith.constant dense<0.000000e+00> : vector<8x128xf32>
    %165 = tpu.matmul %147, %7, %cst_55 {dimension_numbers = #tpu.dot_dimension_numbers<[1], [0], [0], [1], [0, 0, 1, 1], [], []>} : vector<8x32xf32>, vector<32x128xf32>, vector<8x128xf32> -> vector<8x128xf32>
    %c32_56 = arith.constant 32 : index
    %c0_57 = arith.constant 0 : index
    %166 = vector.load %arg10[%c32_56, %c0_57] : memref<64x256xf32, #tpu.memory_space<vmem>>, vector<8x128xf32>
    %167 = arith.addf %165, %166 : vector<8x128xf32>
    %cst_58 = arith.constant dense<0.000000e+00> : vector<8x128xf32>
    %168 = tpu.matmul %162, %8, %cst_58 {dimension_numbers = #tpu.dot_dimension_numbers<[1], [0], [0], [1], [0, 0, 1, 1], [], []>} : vector<8x32xf32>, vector<32x128xf32>, vector<8x128xf32> -> vector<8x128xf32>
    %c24_59 = arith.constant 24 : index
    %c128_60 = arith.constant 128 : index
    %169 = vector.load %arg10[%c24_59, %c128_60] : memref<64x256xf32, #tpu.memory_space<vmem>>, vector<8x128xf32>
    %170 = arith.addf %168, %169 : vector<8x128xf32>
    %171 = arith.negf %167 : vector<8x128xf32>
    %172 = math.exp %171 : vector<8x128xf32>
    %cst_61 = arith.constant 1.000000e+00 : f32
    %173 = vector.broadcast %cst_61 : f32 to vector<8x128xf32>
    %174 = arith.addf %173, %172 : vector<8x128xf32>
    %175 = arith.divf %173, %174 : vector<8x128xf32>
    %176 = math.tanh %167 : vector<8x128xf32>
    %177 = vector.extract_strided_slice %175 {offsets = [0, 0], sizes = [8, 32], strides = [1, 1]} : vector<8x128xf32> to vector<8x32xf32>
    %178 = vector.extract_strided_slice %175 {offsets = [0, 32], sizes = [8, 32], strides = [1, 1]} : vector<8x128xf32> to vector<8x32xf32>
    %179 = vector.extract_strided_slice %176 {offsets = [0, 64], sizes = [8, 32], strides = [1, 1]} : vector<8x128xf32> to vector<8x32xf32>
    %180 = vector.extract_strided_slice %175 {offsets = [0, 96], sizes = [8, 32], strides = [1, 1]} : vector<8x128xf32> to vector<8x32xf32>
    %181 = arith.mulf %178, %145 : vector<8x32xf32>
    %182 = arith.mulf %177, %179 : vector<8x32xf32>
    %183 = arith.addf %181, %182 : vector<8x32xf32>
    %184 = math.tanh %183 : vector<8x32xf32>
    %185 = arith.mulf %180, %184 : vector<8x32xf32>
    %186 = arith.negf %170 : vector<8x128xf32>
    %187 = math.exp %186 : vector<8x128xf32>
    %cst_62 = arith.constant 1.000000e+00 : f32
    %188 = vector.broadcast %cst_62 : f32 to vector<8x128xf32>
    %189 = arith.addf %188, %187 : vector<8x128xf32>
    %190 = arith.divf %188, %189 : vector<8x128xf32>
    %191 = math.tanh %170 : vector<8x128xf32>
    %192 = vector.extract_strided_slice %190 {offsets = [0, 0], sizes = [8, 32], strides = [1, 1]} : vector<8x128xf32> to vector<8x32xf32>
    %193 = vector.extract_strided_slice %190 {offsets = [0, 32], sizes = [8, 32], strides = [1, 1]} : vector<8x128xf32> to vector<8x32xf32>
    %194 = vector.extract_strided_slice %191 {offsets = [0, 64], sizes = [8, 32], strides = [1, 1]} : vector<8x128xf32> to vector<8x32xf32>
    %195 = vector.extract_strided_slice %190 {offsets = [0, 96], sizes = [8, 32], strides = [1, 1]} : vector<8x128xf32> to vector<8x32xf32>
    %196 = arith.mulf %193, %160 : vector<8x32xf32>
    %197 = arith.mulf %192, %194 : vector<8x32xf32>
    %198 = arith.addf %196, %197 : vector<8x32xf32>
    %199 = math.tanh %198 : vector<8x32xf32>
    %200 = arith.mulf %195, %199 : vector<8x32xf32>
    %c32_63 = arith.constant 32 : index
    %c0_64 = arith.constant 0 : index
    %201 = vector.load %arg11[%c32_63, %c0_64] : memref<64x64xf32, #tpu.memory_space<vmem>>, vector<8x32xf32>
    tpu.vector_store %arg11[%c32_63, %c0_64], %185 {strides = array<i32>} : memref<64x64xf32, #tpu.memory_space<vmem>>, vector<8x32xf32>,
    %c24_65 = arith.constant 24 : index
    %c32_66 = arith.constant 32 : index
    %202 = vector.load %arg11[%c24_65, %c32_66] : memref<64x64xf32, #tpu.memory_space<vmem>>, vector<8x32xf32>
    tpu.vector_store %arg11[%c24_65, %c32_66], %200 {strides = array<i32>} : memref<64x64xf32, #tpu.memory_space<vmem>>, vector<8x32xf32>,
    %cst_67 = arith.constant dense<0.000000e+00> : vector<8x128xf32>
    %203 = tpu.matmul %185, %7, %cst_67 {dimension_numbers = #tpu.dot_dimension_numbers<[1], [0], [0], [1], [0, 0, 1, 1], [], []>} : vector<8x32xf32>, vector<32x128xf32>, vector<8x128xf32> -> vector<8x128xf32>
    %c40_68 = arith.constant 40 : index
    %c0_69 = arith.constant 0 : index
    %204 = vector.load %arg10[%c40_68, %c0_69] : memref<64x256xf32, #tpu.memory_space<vmem>>, vector<8x128xf32>
    %205 = arith.addf %203, %204 : vector<8x128xf32>
    %cst_70 = arith.constant dense<0.000000e+00> : vector<8x128xf32>
    %206 = tpu.matmul %200, %8, %cst_70 {dimension_numbers = #tpu.dot_dimension_numbers<[1], [0], [0], [1], [0, 0, 1, 1], [], []>} : vector<8x32xf32>, vector<32x128xf32>, vector<8x128xf32> -> vector<8x128xf32>
    %c16_71 = arith.constant 16 : index
    %c128_72 = arith.constant 128 : index
    %207 = vector.load %arg10[%c16_71, %c128_72] : memref<64x256xf32, #tpu.memory_space<vmem>>, vector<8x128xf32>
    %208 = arith.addf %206, %207 : vector<8x128xf32>
    %209 = arith.negf %205 : vector<8x128xf32>
    %210 = math.exp %209 : vector<8x128xf32>
    %cst_73 = arith.constant 1.000000e+00 : f32
    %211 = vector.broadcast %cst_73 : f32 to vector<8x128xf32>
    %212 = arith.addf %211, %210 : vector<8x128xf32>
    %213 = arith.divf %211, %212 : vector<8x128xf32>
    %214 = math.tanh %205 : vector<8x128xf32>
    %215 = vector.extract_strided_slice %213 {offsets = [0, 0], sizes = [8, 32], strides = [1, 1]} : vector<8x128xf32> to vector<8x32xf32>
    %216 = vector.extract_strided_slice %213 {offsets = [0, 32], sizes = [8, 32], strides = [1, 1]} : vector<8x128xf32> to vector<8x32xf32>
    %217 = vector.extract_strided_slice %214 {offsets = [0, 64], sizes = [8, 32], strides = [1, 1]} : vector<8x128xf32> to vector<8x32xf32>
    %218 = vector.extract_strided_slice %213 {offsets = [0, 96], sizes = [8, 32], strides = [1, 1]} : vector<8x128xf32> to vector<8x32xf32>
    %219 = arith.mulf %216, %183 : vector<8x32xf32>
    %220 = arith.mulf %215, %217 : vector<8x32xf32>
    %221 = arith.addf %219, %220 : vector<8x32xf32>
    %222 = math.tanh %221 : vector<8x32xf32>
    %223 = arith.mulf %218, %222 : vector<8x32xf32>
    %224 = arith.negf %208 : vector<8x128xf32>
    %225 = math.exp %224 : vector<8x128xf32>
    %cst_74 = arith.constant 1.000000e+00 : f32
    %226 = vector.broadcast %cst_74 : f32 to vector<8x128xf32>
    %227 = arith.addf %226, %225 : vector<8x128xf32>
    %228 = arith.divf %226, %227 : vector<8x128xf32>
    %229 = math.tanh %208 : vector<8x128xf32>
    %230 = vector.extract_strided_slice %228 {offsets = [0, 0], sizes = [8, 32], strides = [1, 1]} : vector<8x128xf32> to vector<8x32xf32>
    %231 = vector.extract_strided_slice %228 {offsets = [0, 32], sizes = [8, 32], strides = [1, 1]} : vector<8x128xf32> to vector<8x32xf32>
    %232 = vector.extract_strided_slice %229 {offsets = [0, 64], sizes = [8, 32], strides = [1, 1]} : vector<8x128xf32> to vector<8x32xf32>
    %233 = vector.extract_strided_slice %228 {offsets = [0, 96], sizes = [8, 32], strides = [1, 1]} : vector<8x128xf32> to vector<8x32xf32>
    %234 = arith.mulf %231, %198 : vector<8x32xf32>
    %235 = arith.mulf %230, %232 : vector<8x32xf32>
    %236 = arith.addf %234, %235 : vector<8x32xf32>
    %237 = math.tanh %236 : vector<8x32xf32>
    %238 = arith.mulf %233, %237 : vector<8x32xf32>
    %c40_75 = arith.constant 40 : index
    %c0_76 = arith.constant 0 : index
    %239 = vector.load %arg11[%c40_75, %c0_76] : memref<64x64xf32, #tpu.memory_space<vmem>>, vector<8x32xf32>
    tpu.vector_store %arg11[%c40_75, %c0_76], %223 {strides = array<i32>} : memref<64x64xf32, #tpu.memory_space<vmem>>, vector<8x32xf32>,
    %c16_77 = arith.constant 16 : index
    %c32_78 = arith.constant 32 : index
    %240 = vector.load %arg11[%c16_77, %c32_78] : memref<64x64xf32, #tpu.memory_space<vmem>>, vector<8x32xf32>
    tpu.vector_store %arg11[%c16_77, %c32_78], %238 {strides = array<i32>} : memref<64x64xf32, #tpu.memory_space<vmem>>, vector<8x32xf32>,
    %cst_79 = arith.constant dense<0.000000e+00> : vector<8x128xf32>
    %241 = tpu.matmul %223, %7, %cst_79 {dimension_numbers = #tpu.dot_dimension_numbers<[1], [0], [0], [1], [0, 0, 1, 1], [], []>} : vector<8x32xf32>, vector<32x128xf32>, vector<8x128xf32> -> vector<8x128xf32>
    %c48_80 = arith.constant 48 : index
    %c0_81 = arith.constant 0 : index
    %242 = vector.load %arg10[%c48_80, %c0_81] : memref<64x256xf32, #tpu.memory_space<vmem>>, vector<8x128xf32>
    %243 = arith.addf %241, %242 : vector<8x128xf32>
    %cst_82 = arith.constant dense<0.000000e+00> : vector<8x128xf32>
    %244 = tpu.matmul %238, %8, %cst_82 {dimension_numbers = #tpu.dot_dimension_numbers<[1], [0], [0], [1], [0, 0, 1, 1], [], []>} : vector<8x32xf32>, vector<32x128xf32>, vector<8x128xf32> -> vector<8x128xf32>
    %c8_83 = arith.constant 8 : index
    %c128_84 = arith.constant 128 : index
    %245 = vector.load %arg10[%c8_83, %c128_84] : memref<64x256xf32, #tpu.memory_space<vmem>>, vector<8x128xf32>
    %246 = arith.addf %244, %245 : vector<8x128xf32>
    %247 = arith.negf %243 : vector<8x128xf32>
    %248 = math.exp %247 : vector<8x128xf32>
    %cst_85 = arith.constant 1.000000e+00 : f32
    %249 = vector.broadcast %cst_85 : f32 to vector<8x128xf32>
    %250 = arith.addf %249, %248 : vector<8x128xf32>
    %251 = arith.divf %249, %250 : vector<8x128xf32>
    %252 = math.tanh %243 : vector<8x128xf32>
    %253 = vector.extract_strided_slice %251 {offsets = [0, 0], sizes = [8, 32], strides = [1, 1]} : vector<8x128xf32> to vector<8x32xf32>
    %254 = vector.extract_strided_slice %251 {offsets = [0, 32], sizes = [8, 32], strides = [1, 1]} : vector<8x128xf32> to vector<8x32xf32>
    %255 = vector.extract_strided_slice %252 {offsets = [0, 64], sizes = [8, 32], strides = [1, 1]} : vector<8x128xf32> to vector<8x32xf32>
    %256 = vector.extract_strided_slice %251 {offsets = [0, 96], sizes = [8, 32], strides = [1, 1]} : vector<8x128xf32> to vector<8x32xf32>
    %257 = arith.mulf %254, %221 : vector<8x32xf32>
    %258 = arith.mulf %253, %255 : vector<8x32xf32>
    %259 = arith.addf %257, %258 : vector<8x32xf32>
    %260 = math.tanh %259 : vector<8x32xf32>
    %261 = arith.mulf %256, %260 : vector<8x32xf32>
    %262 = arith.negf %246 : vector<8x128xf32>
    %263 = math.exp %262 : vector<8x128xf32>
    %cst_86 = arith.constant 1.000000e+00 : f32
    %264 = vector.broadcast %cst_86 : f32 to vector<8x128xf32>
    %265 = arith.addf %264, %263 : vector<8x128xf32>
    %266 = arith.divf %264, %265 : vector<8x128xf32>
    %267 = math.tanh %246 : vector<8x128xf32>
    %268 = vector.extract_strided_slice %266 {offsets = [0, 0], sizes = [8, 32], strides = [1, 1]} : vector<8x128xf32> to vector<8x32xf32>
    %269 = vector.extract_strided_slice %266 {offsets = [0, 32], sizes = [8, 32], strides = [1, 1]} : vector<8x128xf32> to vector<8x32xf32>
    %270 = vector.extract_strided_slice %267 {offsets = [0, 64], sizes = [8, 32], strides = [1, 1]} : vector<8x128xf32> to vector<8x32xf32>
    %271 = vector.extract_strided_slice %266 {offsets = [0, 96], sizes = [8, 32], strides = [1, 1]} : vector<8x128xf32> to vector<8x32xf32>
    %272 = arith.mulf %269, %236 : vector<8x32xf32>
    %273 = arith.mulf %268, %270 : vector<8x32xf32>
    %274 = arith.addf %272, %273 : vector<8x32xf32>
    %275 = math.tanh %274 : vector<8x32xf32>
    %276 = arith.mulf %271, %275 : vector<8x32xf32>
    %c48_87 = arith.constant 48 : index
    %c0_88 = arith.constant 0 : index
    %277 = vector.load %arg11[%c48_87, %c0_88] : memref<64x64xf32, #tpu.memory_space<vmem>>, vector<8x32xf32>
    tpu.vector_store %arg11[%c48_87, %c0_88], %261 {strides = array<i32>} : memref<64x64xf32, #tpu.memory_space<vmem>>, vector<8x32xf32>,
    %c8_89 = arith.constant 8 : index
    %c32_90 = arith.constant 32 : index
    %278 = vector.load %arg11[%c8_89, %c32_90] : memref<64x64xf32, #tpu.memory_space<vmem>>, vector<8x32xf32>
    tpu.vector_store %arg11[%c8_89, %c32_90], %276 {strides = array<i32>} : memref<64x64xf32, #tpu.memory_space<vmem>>, vector<8x32xf32>,
    %cst_91 = arith.constant dense<0.000000e+00> : vector<8x128xf32>
    %279 = tpu.matmul %261, %7, %cst_91 {dimension_numbers = #tpu.dot_dimension_numbers<[1], [0], [0], [1], [0, 0, 1, 1], [], []>} : vector<8x32xf32>, vector<32x128xf32>, vector<8x128xf32> -> vector<8x128xf32>
    %c56_92 = arith.constant 56 : index
    %c0_93 = arith.constant 0 : index
    %280 = vector.load %arg10[%c56_92, %c0_93] : memref<64x256xf32, #tpu.memory_space<vmem>>, vector<8x128xf32>
    %281 = arith.addf %279, %280 : vector<8x128xf32>
    %cst_94 = arith.constant dense<0.000000e+00> : vector<8x128xf32>
    %282 = tpu.matmul %276, %8, %cst_94 {dimension_numbers = #tpu.dot_dimension_numbers<[1], [0], [0], [1], [0, 0, 1, 1], [], []>} : vector<8x32xf32>, vector<32x128xf32>, vector<8x128xf32> -> vector<8x128xf32>
    %c0_95 = arith.constant 0 : index
    %c128_96 = arith.constant 128 : index
    %283 = vector.load %arg10[%c0_95, %c128_96] : memref<64x256xf32, #tpu.memory_space<vmem>>, vector<8x128xf32>
    %284 = arith.addf %282, %283 : vector<8x128xf32>
    %285 = arith.negf %281 : vector<8x128xf32>
    %286 = math.exp %285 : vector<8x128xf32>
    %cst_97 = arith.constant 1.000000e+00 : f32
    %287 = vector.broadcast %cst_97 : f32 to vector<8x128xf32>
    %288 = arith.addf %287, %286 : vector<8x128xf32>
    %289 = arith.divf %287, %288 : vector<8x128xf32>
    %290 = math.tanh %281 : vector<8x128xf32>
    %291 = vector.extract_strided_slice %289 {offsets = [0, 0], sizes = [8, 32], strides = [1, 1]} : vector<8x128xf32> to vector<8x32xf32>
    %292 = vector.extract_strided_slice %289 {offsets = [0, 32], sizes = [8, 32], strides = [1, 1]} : vector<8x128xf32> to vector<8x32xf32>
    %293 = vector.extract_strided_slice %290 {offsets = [0, 64], sizes = [8, 32], strides = [1, 1]} : vector<8x128xf32> to vector<8x32xf32>
    %294 = vector.extract_strided_slice %289 {offsets = [0, 96], sizes = [8, 32], strides = [1, 1]} : vector<8x128xf32> to vector<8x32xf32>
    %295 = arith.mulf %292, %259 : vector<8x32xf32>
    %296 = arith.mulf %291, %293 : vector<8x32xf32>
    %297 = arith.addf %295, %296 : vector<8x32xf32>
    %298 = math.tanh %297 : vector<8x32xf32>
    %299 = arith.mulf %294, %298 : vector<8x32xf32>
    %300 = arith.negf %284 : vector<8x128xf32>
    %301 = math.exp %300 : vector<8x128xf32>
    %cst_98 = arith.constant 1.000000e+00 : f32
    %302 = vector.broadcast %cst_98 : f32 to vector<8x128xf32>
    %303 = arith.addf %302, %301 : vector<8x128xf32>
    %304 = arith.divf %302, %303 : vector<8x128xf32>
    %305 = math.tanh %284 : vector<8x128xf32>
    %306 = vector.extract_strided_slice %304 {offsets = [0, 0], sizes = [8, 32], strides = [1, 1]} : vector<8x128xf32> to vector<8x32xf32>
    %307 = vector.extract_strided_slice %304 {offsets = [0, 32], sizes = [8, 32], strides = [1, 1]} : vector<8x128xf32> to vector<8x32xf32>
    %308 = vector.extract_strided_slice %305 {offsets = [0, 64], sizes = [8, 32], strides = [1, 1]} : vector<8x128xf32> to vector<8x32xf32>
    %309 = vector.extract_strided_slice %304 {offsets = [0, 96], sizes = [8, 32], strides = [1, 1]} : vector<8x128xf32> to vector<8x32xf32>
    %310 = arith.mulf %307, %274 : vector<8x32xf32>
    %311 = arith.mulf %306, %308 : vector<8x32xf32>
    %312 = arith.addf %310, %311 : vector<8x32xf32>
    %313 = math.tanh %312 : vector<8x32xf32>
    %314 = arith.mulf %309, %313 : vector<8x32xf32>
    %c56_99 = arith.constant 56 : index
    %c0_100 = arith.constant 0 : index
    %315 = vector.load %arg11[%c56_99, %c0_100] : memref<64x64xf32, #tpu.memory_space<vmem>>, vector<8x32xf32>
    tpu.vector_store %arg11[%c56_99, %c0_100], %299 {strides = array<i32>} : memref<64x64xf32, #tpu.memory_space<vmem>>, vector<8x32xf32>,
    %c0_101 = arith.constant 0 : index
    %c32_102 = arith.constant 32 : index
    %316 = vector.load %arg11[%c0_101, %c32_102] : memref<64x64xf32, #tpu.memory_space<vmem>>, vector<8x32xf32>
    tpu.vector_store %arg11[%c0_101, %c32_102], %314 {strides = array<i32>} : memref<64x64xf32, #tpu.memory_space<vmem>>, vector<8x32xf32>,
    %c0_103 = arith.constant 0 : index
    %c0_104 = arith.constant 0 : index
    %317 = vector.load %arg11[%c0_103, %c0_104] : memref<64x64xf32, #tpu.memory_space<vmem>>, vector<64x64xf32>
    %c0_105 = arith.constant 0 : index
    %c0_106 = arith.constant 0 : index
    %318 = vector.load %arg5[%c0_105, %c0_106] : memref<64x32xf32, #tpu.memory_space<vmem>>, vector<64x32xf32>
    %cst_107 = arith.constant dense<0.000000e+00> : vector<64x32xf32>
    %319 = tpu.matmul %317, %318, %cst_107 {dimension_numbers = #tpu.dot_dimension_numbers<[1], [0], [0], [1], [0, 0, 1, 1], [], []>} : vector<64x64xf32>, vector<64x32xf32>, vector<64x32xf32> -> vector<64x32xf32>
    %320 = math.tanh %319 : vector<64x32xf32>
    %c0_108 = arith.constant 0 : index
    %c0_109 = arith.constant 0 : index
    %321 = vector.load %arg6[%c0_108, %c0_109] : memref<1x32xf32, #tpu.memory_space<vmem>>, vector<1x32xf32>
    %322 = vector.broadcast %321 : vector<1x32xf32> to vector<64x32xf32>
    %323 = arith.mulf %320, %322 : vector<64x32xf32>
    %cst_110 = arith.constant dense<0.000000e+00> : vector<64xf32>
    %324 = vector.multi_reduction <add>, %323, %cst_110 [1] : vector<64x32xf32> to vector<64xf32>
    %325 = vector.shape_cast %324 : vector<64xf32> to vector<64x1xf32>
    %326 = vector.shape_cast %325 : vector<64x1xf32> to vector<8x8xf32>
    %cst_111 = arith.constant dense<0xFF800000> : vector<8xf32>
    %327 = vector.multi_reduction <maximumf>, %326, %cst_111 [1] : vector<8x8xf32> to vector<8xf32>
    %328 = vector.shape_cast %327 : vector<8xf32> to vector<8x1xf32>
    %329 = vector.broadcast %328 : vector<8x1xf32> to vector<8x8xf32>
    %330 = arith.subf %326, %329 : vector<8x8xf32>
    %331 = math.exp %330 : vector<8x8xf32>
    %cst_112 = arith.constant dense<0.000000e+00> : vector<8xf32>
    %332 = vector.multi_reduction <add>, %331, %cst_112 [1] : vector<8x8xf32> to vector<8xf32>
    %333 = vector.shape_cast %332 : vector<8xf32> to vector<8x1xf32>
    %334 = vector.broadcast %333 : vector<8x1xf32> to vector<8x8xf32>
    %335 = arith.divf %331, %334 : vector<8x8xf32>
    %336 = tpu.transpose %335, [1, 0] : vector<8x8xf32> -> vector<8x8xf32>
    %337 = vector.shape_cast %317 : vector<64x64xf32> to vector<8x8x64xf32>
    %338 = vector.shape_cast %336 : vector<8x8xf32> to vector<8x8x1xf32>
    %339 = vector.broadcast %338 : vector<8x8x1xf32> to vector<8x8x64xf32>
    %340 = arith.mulf %337, %339 : vector<8x8x64xf32>
    %cst_113 = arith.constant dense<0.000000e+00> : vector<8x64xf32>
    %341 = vector.multi_reduction <add>, %340, %cst_113 [0] : vector<8x8x64xf32> to vector<8x64xf32>
    %c0_114 = arith.constant 0 : index
    %c0_115 = arith.constant 0 : index
    %342 = vector.load %arg7[%c0_114, %c0_115] : memref<64x128xf32, #tpu.memory_space<vmem>>, vector<64x128xf32>
    %cst_116 = arith.constant dense<0.000000e+00> : vector<8x128xf32>
    %343 = tpu.matmul %341, %342, %cst_116 {dimension_numbers = #tpu.dot_dimension_numbers<[1], [0], [0], [1], [0, 0, 1, 1], [], []>} : vector<8x64xf32>, vector<64x128xf32>, vector<8x128xf32> -> vector<8x128xf32>
    %c0_117 = arith.constant 0 : index
    %c0_118 = arith.constant 0 : index
    %344 = vector.load %arg8[%c0_117, %c0_118] : memref<1x128xf32, #tpu.memory_space<vmem>>, vector<1x128xf32>
    %345 = vector.broadcast %344 : vector<1x128xf32> to vector<8x128xf32>
    %346 = arith.addf %343, %345 : vector<8x128xf32>
    %c0_119 = arith.constant 0 : index
    %c0_120 = arith.constant 0 : index
    %347 = vector.load %arg9[%c0_119, %c0_120] : memref<8x128xf32, #tpu.memory_space<vmem>>, vector<8x128xf32>
    tpu.vector_store %arg9[%c0_119, %c0_120], %346 {strides = array<i32>} : memref<8x128xf32, #tpu.memory_space<vmem>>, vector<8x128xf32>,
    return
  }
}

</mosaic_0001>

<bundles_post_ra>
// kernel: tpu_custom_call.1
= control target key start
LH: loop header
LB: loop body
LE: loop exit
PB: predicated region body
PF: predicated region fallthrough
CT: control target
= control target key end

     0   :  { %14 = vsyncpa [#allocation5], 0  ;;  %s4040_s0 = inlined_call_operand.vmem [shape: f32[64,32], index: 0, kind: input, shape index: {}]   ;;  %s4041_s1 = inlined_call_operand.vmem [shape: f32[32,256], index: 1, kind: input, shape index: {}]   ;;  %s4042_s2 = inlined_call_operand.vmem [shape: f32[1,256], index: 2, kind: input, shape index: {}]   ;;  %s4043_s3 = inlined_call_operand.vmem [shape: f32[32,128], index: 3, kind: input, shape index: {}]   ;;  %s4044_s4 = inlined_call_operand.hbm [shape: f32[32,128], index: 4, kind: input, shape index: {}]   ;;  %s4045_s5 = inlined_call_operand.vmem [shape: f32[64,32], index: 5, kind: input, shape index: {}]   ;;  %s4046_s6 = inlined_call_operand.vmem [shape: f32[1,32], index: 6, kind: input, shape index: {}]   ;;  %s4047_s7 = inlined_call_operand.vmem [shape: f32[64,128], index: 7, kind: input, shape index: {}]   ;;  %s4048_s8 = inlined_call_operand.vmem [shape: f32[1,128], index: 8, kind: input, shape index: {}]   ;;  %s4049_s9 = inlined_call_operand.hbm [shape: f32[8,128], index: 9, kind: output, shape index: {}]  }
   0x1   :  { %15 = vsyncpa [#allocation6], 0  ;;  %s3234_s30 = smov [#allocation4]  }
   0x2   :  { %s29_s10 = sshll.u32 %s3234_s30, 4  ;;  %s30_s10 = int_to_ptr.vmem [resolvable:$true] %s29_s10 }
   0x3   :  { %s3198_s11 = scalar_lea.vmem %s30_s10, 512  ;;  %p3203_p1 = scmp.lt.s32.totalorder %s30_s10, %s30_s10 }
   0x4   :  { %p3199_p0 = scmp.ne.s32.totalorder %s30_s10, %s3198_s11  ;;  %p3204_p2 = scmp.lt.s32.totalorder %s3198_s11, %s3198_s11 }
   0x6   :  { %p3205_p3 = por %p3204_p2, %p3203_p1 }
   0x8   :  { %p3206_p4 = pnand %p3205_p3, %p3199_p0 }
   0xa   :  { %3209 = shalt.err (!%p3206_p4)
}
   0xb   :  { %s3235_s12 = smov 128   ;;  %s3236_s13 = smov 8  }
   0xc   :  { %35 = dma.hbm_to_vmem [thread:$0]  %s4044_s4, 512, %s30_s10, [#allocation5], %s3235_s12, %s3235_s12, %s3236_s13  }
   0xd   :  { %3230 = dma.done.wait [#allocation5], 512  }
   0xe   :  { %3231 = vsyncadd [#allocation5], 4294966784  ;;  %v3237_v0 = vmov 0.0   ;;  %vm3238_vm0 = vmmov 0   ;;  %v62_v1 = vld [vmem:[%s4041_s1 + $0x38] sm:$0xff]  ;;  %v61_v2 = vld [vmem:[%s4041_s1 + $0x30] sm:$0xff]  ;;  %v65_v25 = vlaneseq }
   0xf   :  { %2775 = vmatprep.subr.mxu1 %v3237_v0  ;;  %164 = vmatprep.mubr.f32.mxu0 %v3237_v0  ;;  %v60_v3 = vld [vmem:[%s4041_s1 + $0x28] sm:$0xff]  ;;  %v59_v4 = vld [vmem:[%s4041_s1 + $0x20] sm:$0xff]  ;;  %v3315_v5 = vld [vmem:[%s4043_s3 + $0x18] sm:$0xff]  ;;  %vm75_vm1 = vcmask 261120   ;;  %vm439_vm2 = vcmask 523520   ;;  %vm1899_vm3 = vcmask 523264  }
  0x10   :  { %2783 = vmatprep.mubr.msk.f32.mxu1 %vm3238_vm0, %v3237_v0  ;;  %124 = vmatprep.subr.mxu0 %v62_v1  ;;  %v58_v6 = vld [vmem:[%s4041_s1 + $0x18] sm:$0xff]  ;;  %v3324_v7 = vld [vmem:[%s4043_s3 + $0x10] sm:$0xff]  ;;  %v3333_v9 = vld [vmem:[%s4043_s3 + $0x8] sm:$0xff]  ;;  %v3433_v26 = vshrl.u32 %v65_v25, 7  ;;  %vm2118_vm4 = vcmask 1041409   ;;  %vm2120_vm5 = vcmask 1042434  }
  0x11   :  { %125 = vmatpush1.msra.mxu0 %v61_v2  ;;  %2776 = vmatpush3.msra.mxu1 %v3315_v5  ;;  %v57_v8 = vld [vmem:[%s4041_s1 + $0x10] sm:$0xff]  ;;  %v56_v10 = vld [vmem:[%s4041_s1 + $0x8] sm:$0xff]  ;;  %v55_v11 = vld [vmem:[%s4041_s1] sm:$0xff]  ;;  %vm2122_vm6 = vcmask 1043459   ;;  %vm2124_vm7 = vcmask 1044484   ;;  %vm2126_vm8 = vcmask 1045509  }
  0x12   :  { %126 = vmatprep.subr.mxu0 %v60_v3  ;;  %2777 = vmatprep.subr.mxu1 %v3237_v0  ;;  %v3346_v12 = vld [vmem:[%s4043_s3] sm:$0xff]  ;;  %v3354_v14 = vld [vmem:[#allocation4 + $0x18] sm:$0xff]  ;;  %v48_v15 = vld [vmem:[%s4040_s0 + $0x8] sm:$0xff]  ;;  %v3436_v27 = vsub.s32 0, %v3433_v26  ;;  %v3442_v29 = vsub.s32 1, %v3433_v26  ;;  %vm2128_vm9 = vcmask 1046534  }
  0x13   :  { %127 = vmatpush1.msra.mxu0 %v59_v4  ;;  %2778 = vmatpush3.msra.mxu1 %v3324_v7  ;;  %v47_v13 = vld [vmem:[%s4040_s0] sm:$0xff]  ;;  %v3363_v16 = vld [vmem:[#allocation4 + $0x10] sm:$0xff]  ;;  %v3369_v17 = vld [vmem:[#allocation4 + $0x8] sm:$0xff]  ;;  %vm2130_vm10 = vcmask 1047559   ;;  %vm2133_vm11 = vcmask 64512   ;;  %s3242_s25 = smov [#allocation7]  }
  0x14   :  { %128 = vmatprep.subr.mxu0 %v58_v6  ;;  %2779 = vmatprep.subr.mxu1 %v3237_v0  ;;  %v49_v18 = vld [vmem:[%s4040_s0 + $0x10] sm:$0xff]  ;;  %v3379_v19 = vld [vmem:[#allocation4] sm:$0xff]  ;;  %v50_v20 = vld [vmem:[%s4040_s0 + $0x18] sm:$0xff]  ;;  %s2612_s26 = sshll.u32 %s3242_s25, 4  ;;  %s2613_s26 = int_to_ptr.vmem [resolvable:$true] %s2612_s26 }
  0x15   :  { %129 = vmatpush1.msra.mxu0 %v57_v8  ;;  %2780 = vmatpush3.msra.mxu1 %v3333_v9  ;;  %v51_v21 = vld [vmem:[%s4040_s0 + $0x20] sm:$0xff]  ;;  %v52_v22 = vld [vmem:[%s4040_s0 + $0x28] sm:$0xff]  ;;  %v53_v23 = vld [vmem:[%s4040_s0 + $0x30] sm:$0xff]  ;;  %s3210_s27 = scalar_lea.vmem %s2613_s26, 128  ;;  %p3215_p6 = scmp.lt.s32.totalorder %s2613_s26, %s2613_s26 }
  0x16   :  { %130 = vmatprep.subr.mxu0 %v56_v10  ;;  %2781 = vmatprep.subr.mxu1 %v3237_v0  ;;  %v54_v24 = vld [vmem:[%s4040_s0 + $0x38] sm:$0xff]  ;;  %v63_v28 = vld [vmem:[%s4042_s2] sm:$0x3]  ;;  %s3239_s0 = smov 64   ;;  %s3240_s2 = smov 32  }
  0x17   :  { %131 = vmatpush1.msra.mxu0 %v55_v11  ;;  %2782 = vmatpush3.msra.mxu1 %v3346_v12  ;;  %v68_v30 = vrot.slane %v63_v28, %v3436_v27  ;;  %v72_v31 = vrot.slane %v63_v28, %v3442_v29  ;;  %p3211_p5 = scmp.ne.s32.totalorder %s2613_s26, %s3210_s27  ;;  %p3216_p7 = scmp.lt.s32.totalorder %s3210_s27, %s3210_s27 }
  0x18   :  { %2621 = vmatmul.mubr.msk.f32.vlgmr.msra.gmra.mxu0 %vm75_vm1, %v47_v13  ;;  %2784 = vmatmul.mubr.f32.vlgmr.msra.gmra.mxu1 %v3237_v0 }
  0x19   :  { %170 = vmatprep.mubr.f32.mxu0 %v3237_v0  ;;  %2786 = vmatprep.subr.mxu1 %v3237_v0  ;;  %p3217_p8 = por %p3216_p7, %p3215_p6 }
  0x1a   :  { %2787 = vmatpush3.msra.mxu1 %v3354_v14  ;;  %2794 = vmatprep.mubr.msk.f32.mxu1 %vm3238_vm0, %v3237_v0 }
  0x1b   :  { %2788 = vmatprep.subr.mxu1 %v3237_v0  ;;  %2841 = vmatprep.subr.mxu0 %v3237_v0  ;;  %p3218_p9 = pnand %p3217_p8, %p3211_p5 }
  0x1c   :  { %2622 = vmatmul.mubr.msk.f32.gmra.mxu0 %vm75_vm1, %v48_v15  ;;  %2789 = vmatpush3.msra.mxu1 %v3363_v16 }
  0x1d   :  { %176 = vmatprep.mubr.f32.mxu0 %v3237_v0  ;;  %2790 = vmatprep.subr.mxu1 %v3237_v0 }
  0x1e   :  { %2791 = vmatpush3.msra.mxu1 %v3369_v17  ;;  %2842 = vmatpush3.msra.mxu0 %v3315_v5 }
  0x1f   :  { %2792 = vmatprep.subr.mxu1 %v3237_v0  ;;  %2843 = vmatprep.subr.mxu0 %v3237_v0 }
  0x20   :  { %2623 = vmatmul.mubr.msk.f32.gmra.mxu0 %vm75_vm1, %v49_v18  ;;  %2793 = vmatpush3.msra.mxu1 %v3379_v19 }
  0x21   :  { %182 = vmatprep.mubr.f32.mxu0 %v3237_v0  ;;  %2795 = vmatmul.mubr.f32.vlgmr.msra.gmra.mxu1 %v3237_v0 }
  0x22   :  { %2797 = vmatprep.subr.mxu1 %v3237_v0  ;;  %2805 = vmatprep.mubr.msk.f32.mxu1 %vm3238_vm0, %v3237_v0 }
  0x23   :  { %2798 = vmatpush3.msra.mxu1 %v3315_v5  ;;  %2844 = vmatpush3.msra.mxu0 %v3324_v7 }
  0x24   :  { %2624 = vmatmul.mubr.msk.f32.gmra.mxu0 %vm75_vm1, %v50_v20  ;;  %2799 = vmatprep.subr.mxu1 %v3237_v0 }
  0x25   :  { %188 = vmatprep.mubr.f32.mxu0 %v3237_v0  ;;  %2800 = vmatpush3.msra.mxu1 %v3324_v7 }
  0x26   :  { %2801 = vmatprep.subr.mxu1 %v3237_v0  ;;  %2845 = vmatprep.subr.mxu0 %v3237_v0 }
  0x27   :  { %2802 = vmatpush3.msra.mxu1 %v3333_v9  ;;  %2846 = vmatpush3.msra.mxu0 %v3333_v9 }
  0x28   :  { %2625 = vmatmul.mubr.msk.f32.gmra.mxu0 %vm75_vm1, %v51_v21  ;;  %2803 = vmatprep.subr.mxu1 %v3237_v0 }
  0x29   :  { %194 = vmatprep.mubr.f32.mxu0 %v3237_v0  ;;  %2804 = vmatpush3.msra.mxu1 %v3346_v12 }
  0x2a   :  { %2808 = vmatprep.subr.mxu1 %v3237_v0  ;;  %2847 = vmatprep.subr.mxu0 %v3237_v0 }
  0x2b   :  { %2848 = vmatpush3.msra.mxu0 %v3346_v12 }
  0x2c   :  { %2626 = vmatmul.mubr.msk.f32.gmra.mxu0 %vm75_vm1, %v52_v22  ;;  %2863 = vmatprep.subr.mxu0 %v3237_v0 }
  0x2d   :  { %200 = vmatprep.mubr.f32.mxu0 %v3237_v0 }
  0x30   :  { %2627 = vmatmul.mubr.msk.f32.gmra.mxu0 %vm75_vm1, %v53_v23 }
  0x31   :  { %206 = vmatprep.mubr.f32.mxu0 %v3237_v0 }
  0x34   :  { %2628 = vmatmul.mubr.msk.f32.gmra.mxu0 %vm75_vm1, %v54_v24 }
  0x35   :  { %2849 = vmatprep.mubr.msk.f32.mxu0 %vm3238_vm0, %v3237_v0 }
  0xd8   :  { %v166_v32 = vpop.f32.mrf.mxu0  ;;  %v307_v33 = vpop.f32.mrf.mxu1 }
  0xd9   :  { %v167_v34 = vadd.f32 %v166_v32, %v68_v30 }
  0xda   :  { %v168_v35 = vpop.f32.mrf.mxu0  ;;  %v2785_v36 = vpop.f32.mrf.mxu1 }
  0xdb   :  { %v3446_v37 = vadd.f32 %v168_v35, %v72_v31  ;;  %v308_v38 = vadd.f32 %v307_v33, %v167_v34 }
  0xdc   :  { %v172_v39 = vpop.f32.mrf.mxu0 }
  0xdd   :  { %3009 = vtanh.f32 %v308_v38  ;;  %v3448_v40 = vadd.f32 %v172_v39, %v68_v30  ;;  %v2629_v13 = vmul.f32 -1.442695, %v308_v38 }
  0xde   :  { %v174_v41 = vpop.f32.mrf.mxu0 }
  0xdf   :  { %v3450_v42 = vadd.f32 %v174_v41, %v72_v31 }
  0xe0   :  { %v178_v43 = vpop.f32.mrf.mxu0 }
  0xe1   :  { %v3452_v44 = vadd.f32 %v178_v43, %v68_v30  ;;  %v378_v45 = vpop.f32.mrf.mxu1 }
  0xe2   :  { %v180_v46 = vpop.f32.mrf.mxu0 }
  0xe3   :  { %v3454_v47 = vadd.f32 %v180_v46, %v72_v31  ;;  %v2796_v48 = vpop.f32.mrf.mxu1 }
  0xe4   :  { %v184_v49 = vpop.f32.mrf.mxu0 }
  0xe5   :  { %v3456_v50 = vadd.f32 %v184_v49, %v68_v30 }
  0xe6   :  { %v186_v51 = vpop.f32.mrf.mxu0 }
  0xe7   :  { %v3458_v52 = vadd.f32 %v186_v51, %v72_v31 }
  0xe8   :  { %v190_v53 = vpop.f32.mrf.mxu0 }
  0xe9   :  { %v3460_v54 = vadd.f32 %v190_v53, %v68_v30 }
  0xea   :  { %v3010_v55 = vpop.eup %3009  ;;  %v192_v56 = vpop.f32.mrf.mxu0 }
  0xeb   :  { %v3462_v57 = vadd.f32 %v192_v56, %v72_v31  ;;  %391 = vrot.lane.b32.xlu0 %v3010_v55, %s3239_s0 }
  0xec   :  { %v196_v58 = vpop.f32.mrf.mxu0 }
  0xed   :  { %v3465_v59 = vadd.f32 %v196_v58, %v68_v30 }
  0xee   :  { %v198_v60 = vpop.f32.mrf.mxu0 }
  0xef   :  { %v3467_v61 = vadd.f32 %v198_v60, %v72_v31 }
  0xf0   :  { %v202_v62 = vpop.f32.mrf.mxu0 }
  0xf1   :  { %v3469_v63 = vadd.f32 %v202_v62, %v68_v30 }
  0xf2   :  { %v204_v1 = vpop.f32.mrf.mxu0 }
  0xf3   :  { %v3471_v2 = vadd.f32 %v204_v1, %v72_v31 }
  0xf4   :  { %v208_v3 = vpop.f32.mrf.mxu0 }
  0xf5   :  { %v3473_v4 = vadd.f32 %v208_v3, %v68_v30 }
  0xf6   :  { %v210_v6 = vpop.f32.mrf.mxu0 }
  0xf7   :  { %v211_v8 = vadd.f32 %v210_v6, %v72_v31 }
  0xf9   :  { %v379_v10 = vadd.f32 %v378_v45, %v211_v8 }
  0xfb   :  { %3011 = vtanh.f32 %v379_v10  ;;  %v2630_v20 = vmul.f32 -1.442695, %v379_v10 }
  0xfc   :  { %3013 = vpow2.f32 %v2629_v13 }
 0x108   :  { %v3012_v11 = vpop.eup %3011 }
 0x109   :  { %415 = vrot.lane.b32.xlu0 %v3012_v11, %s3239_s0  ;;  %v3014_v15 = vpop.eup %3013 }
 0x10a   :  { %v385_v18 = vadd.f32 1.0, %v3014_v15 }
 0x10c   :  { %3015 = vrcp.f32 %v385_v18 }
 0x10d   :  { %3017 = vpow2.f32 %v2630_v20 }
 0x119   :  { %v3016_v21 = vpop.eup %3015 }
 0x11a   :  { %v3018_v24 = vpop.eup %3017  ;;  %v389_v33 = vmul.f32 0.0, %v3016_v21 }
 0x11b   :  { %v409_v28 = vadd.f32 1.0, %v3018_v24 }
 0x11d   :  { %3019 = vrcp.f32 %v409_v28 }
 0x12a   :  { %v3020_v30 = vpop.eup %3019 }
 0x12b   :  { %v413_v38 = vmul.f32 0.0, %v3020_v30 }
 0x15d   :  { %v392_v22 = vpop.permute.xlu0 %391 }
 0x15e   :  { %v394_v23 = vmul.f32 %v3016_v21, %v392_v22 }
 0x160   :  { %396 = vrot.lane.b32.xlu1 %v394_v23, %s3240_s2 }
 0x17b   :  { %v416_v31 = vpop.permute.xlu0 %415 }
 0x17c   :  { %v418_v32 = vmul.f32 %v3020_v30, %v416_v31 }
 0x17e   :  { %420 = vrot.lane.b32.xlu1 %v418_v32, %s3240_s2 }
 0x1d2   :  { %v397_v34 = vpop.permute.xlu1 %396 }
 0x1d3   :  { %v3478_v35 = vadd.f32 %v397_v34, %v389_v33 }
 0x1d5   :  { %3021 = vtanh.f32 %v3478_v35 }
 0x1e2   :  { %v3022_v36 = vpop.eup %3021 }
 0x1e3   :  { %402 = vrot.lane.b32.xlu0 %v3022_v36, %s3239_s0 }
 0x1f0   :  { %v421_v39 = vpop.permute.xlu1 %420 }
 0x1f1   :  { %v3482_v41 = vadd.f32 %v421_v39, %v413_v38 }
 0x1f3   :  { %3023 = vtanh.f32 %v3482_v41 }
 0x200   :  { %v3024_v43 = vpop.eup %3023 }
 0x201   :  { %426 = vrot.lane.b32.xlu1 %v3024_v43, %s3239_s0 }
 0x255   :  { %v403_v45 = vpop.permute.xlu0 %402 }
 0x256   :  { %v405_v46 = vmul.f32 %v3016_v21, %v403_v45 }
 0x258   :  { %431 = vrot.lane.b32.xlu0 %v405_v46, %s3240_s2 }
 0x273   :  { %v427_v48 = vpop.permute.xlu1 %426 }
 0x274   :  { %v3487_v49 = vmul.f32 %v3020_v30, %v427_v48 }
 0x276   :  { %515 = vrot.lane.b32.xlu1 %v3487_v49, %s3240_s2 }
 0x2ca   :  { %v432_v51 = vpop.permute.xlu0 %431 }
 0x2cb   :  { %434 = vst.msk [vmem:[#allocation3] sm:$0xff] %vm75_vm1, %v432_v51  ;;  %2806 = vmatmul.mubr.msk.f32.vlgmr.msra.gmra.mxu1 %vm75_vm1, %v432_v51 }
 0x2cc   :  { %2809 = vmatpush3.msra.mxu1 %v3354_v14  ;;  %2816 = vmatprep.mubr.msk.f32.mxu1 %vm3238_vm0, %v3237_v0 }
 0x2cd   :  { %2810 = vmatprep.subr.mxu1 %v3237_v0 }
 0x2ce   :  { %2811 = vmatpush3.msra.mxu1 %v3363_v16 }
 0x2cf   :  { %2812 = vmatprep.subr.mxu1 %v3237_v0 }
 0x2d0   :  { %2813 = vmatpush3.msra.mxu1 %v3369_v17 }
 0x2d1   :  { %2814 = vmatprep.subr.mxu1 %v3237_v0 }
 0x2d2   :  { %2815 = vmatpush3.msra.mxu1 %v3379_v19 }
 0x2d3   :  { %2819 = vmatprep.subr.mxu1 %v3237_v0 }
 0x2e8   :  { %v516_v53 = vpop.permute.xlu1 %515 }
 0x2e9   :  { %2817 = vmatmul.mubr.msk.f32.vlgmr.msra.gmra.mxu1 %vm75_vm1, %v516_v53 }
 0x2ea   :  { %2820 = vmatpush3.msra.mxu1 %v3315_v5  ;;  %2827 = vmatprep.mubr.msk.f32.mxu1 %vm3238_vm0, %v3237_v0 }
 0x2eb   :  { %2821 = vmatprep.subr.mxu1 %v3237_v0 }
 0x2ec   :  { %2822 = vmatpush3.msra.mxu1 %v3324_v7 }
 0x2ed   :  { %2823 = vmatprep.subr.mxu1 %v3237_v0 }
 0x2ee   :  { %2824 = vmatpush3.msra.mxu1 %v3333_v9 }
 0x2ef   :  { %2825 = vmatprep.subr.mxu1 %v3237_v0 }
 0x2f0   :  { %2826 = vmatpush3.msra.mxu1 %v3346_v12 }
 0x2f1   :  { %2830 = vmatprep.subr.mxu1 %v3237_v0 }
 0x38b   :  { %v510_v55 = vpop.f32.mrf.mxu1 }
 0x38c   :  { %v511_v56 = vadd.f32 %v510_v55, %v3448_v40 }
 0x38d   :  { %v2807_v58 = vpop.f32.mrf.mxu1 }
 0x38e   :  { %3025 = vtanh.f32 %v511_v56  ;;  %v2633_v8 = vmul.f32 -1.442695, %v511_v56 }
 0x39b   :  { %v3026_v60 = vpop.eup %3025 }
 0x39c   :  { %598 = vrot.lane.b32.xlu0 %v3026_v60, %s3239_s0 }
 0x3a9   :  { %v585_v62 = vpop.f32.mrf.mxu1 }
 0x3aa   :  { %v586_v1 = vadd.f32 %v585_v62, %v3471_v2 }
 0x3ab   :  { %v2818_v3 = vpop.f32.mrf.mxu1 }
 0x3ac   :  { %3027 = vtanh.f32 %v586_v1  ;;  %v2634_v13 = vmul.f32 -1.442695, %v586_v1 }
 0x3ad   :  { %3029 = vpow2.f32 %v2633_v8 }
 0x3b9   :  { %v3028_v6 = vpop.eup %3027 }
 0x3ba   :  { %622 = vrot.lane.b32.xlu1 %v3028_v6, %s3239_s0  ;;  %v3030_v10 = vpop.eup %3029 }
 0x3bb   :  { %v592_v11 = vadd.f32 1.0, %v3030_v10 }
 0x3bd   :  { %3031 = vrcp.f32 %v592_v11 }
 0x3be   :  { %3033 = vpow2.f32 %v2634_v13 }
 0x3ca   :  { %v3032_v40 = vpop.eup %3031 }
 0x3cb   :  { %v3034_v20 = vpop.eup %3033  ;;  %v596_v24 = vmul.f32 %v3032_v40, %v3478_v35 }
 0x3cc   :  { %v616_v21 = vadd.f32 1.0, %v3034_v20 }
 0x3ce   :  { %3035 = vrcp.f32 %v616_v21 }
 0x3db   :  { %v3036_v2 = vpop.eup %3035 }
 0x3dc   :  { %v620_v32 = vmul.f32 %v3036_v2, %v3482_v41 }
 0x40e   :  { %v599_v15 = vpop.permute.xlu0 %598 }
 0x40f   :  { %v601_v18 = vmul.f32 %v3032_v40, %v599_v15 }
 0x411   :  { %603 = vrot.lane.b32.xlu0 %v601_v18, %s3240_s2 }
 0x42c   :  { %v623_v22 = vpop.permute.xlu1 %622 }
 0x42d   :  { %v625_v23 = vmul.f32 %v3036_v2, %v623_v22 }
 0x42f   :  { %627 = vrot.lane.b32.xlu1 %v625_v23, %s3240_s2 }
 0x483   :  { %v604_v28 = vpop.permute.xlu0 %603 }
 0x484   :  { %v3521_v30 = vadd.f32 %v604_v28, %v596_v24 }
 0x486   :  { %3037 = vtanh.f32 %v3521_v30 }
 0x493   :  { %v3038_v31 = vpop.eup %3037 }
 0x494   :  { %609 = vrot.lane.b32.xlu0 %v3038_v31, %s3239_s0 }
 0x4a1   :  { %v628_v33 = vpop.permute.xlu1 %627 }
 0x4a2   :  { %v3526_v34 = vadd.f32 %v628_v33, %v620_v32 }
 0x4a4   :  { %3039 = vtanh.f32 %v3526_v34 }
 0x4b1   :  { %v3040_v36 = vpop.eup %3039 }
 0x4b2   :  { %633 = vrot.lane.b32.xlu1 %v3040_v36, %s3239_s0 }
 0x506   :  { %v610_v38 = vpop.permute.xlu0 %609 }
 0x507   :  { %v612_v35 = vmul.f32 %v3032_v40, %v610_v38 }
 0x509   :  { %638 = vrot.lane.b32.xlu0 %v612_v35, %s3240_s2 }
 0x524   :  { %v634_v39 = vpop.permute.xlu1 %633 }
 0x525   :  { %v3531_v43 = vmul.f32 %v3036_v2, %v634_v39 }
 0x527   :  { %721 = vrot.lane.b32.xlu1 %v3531_v43, %s3240_s2 }
 0x57b   :  { %v639_v45 = vpop.permute.xlu0 %638 }
 0x57c   :  { %641 = vst.msk [vmem:[#allocation3 + $0x8] sm:$0xff] %vm75_vm1, %v639_v45  ;;  %2828 = vmatmul.mubr.msk.f32.vlgmr.msra.gmra.mxu1 %vm75_vm1, %v639_v45 }
 0x57d   :  { %2831 = vmatpush3.msra.mxu1 %v3354_v14  ;;  %2838 = vmatprep.mubr.msk.f32.mxu1 %vm3238_vm0, %v3237_v0 }
 0x57e   :  { %2832 = vmatprep.subr.mxu1 %v3237_v0 }
 0x57f   :  { %2833 = vmatpush3.msra.mxu1 %v3363_v16 }
 0x580   :  { %2834 = vmatprep.subr.mxu1 %v3237_v0 }
 0x581   :  { %2835 = vmatpush3.msra.mxu1 %v3369_v17 }
 0x582   :  { %2836 = vmatprep.subr.mxu1 %v3237_v0 }
 0x583   :  { %2837 = vmatpush3.msra.mxu1 %v3379_v19 }
 0x584   :  { %2852 = vmatprep.subr.mxu1 %v3237_v0 }
 0x599   :  { %v722_v41 = vpop.permute.xlu1 %721 }
 0x59a   :  { %2839 = vmatmul.mubr.msk.f32.vlgmr.msra.gmra.mxu1 %vm75_vm1, %v722_v41 }
 0x59b   :  { %2853 = vmatpush3.msra.mxu1 %v3354_v14  ;;  %2860 = vmatprep.mubr.msk.f32.mxu1 %vm3238_vm0, %v3237_v0 }
 0x59c   :  { %2854 = vmatprep.subr.mxu1 %v3237_v0 }
 0x59d   :  { %2855 = vmatpush3.msra.mxu1 %v3363_v16 }
 0x59e   :  { %2856 = vmatprep.subr.mxu1 %v3237_v0 }
 0x59f   :  { %2857 = vmatpush3.msra.mxu1 %v3369_v17 }
 0x5a0   :  { %2858 = vmatprep.subr.mxu1 %v3237_v0 }
 0x5a1   :  { %2859 = vmatpush3.msra.mxu1 %v3379_v19 }
 0x5a2   :  { %2874 = vmatprep.subr.mxu1 %v3237_v0 }
 0x63c   :  { %v716_v46 = vpop.f32.mrf.mxu1 }
 0x63d   :  { %v717_v48 = vadd.f32 %v716_v46, %v3452_v44 }
 0x63e   :  { %v2829_v51 = vpop.f32.mrf.mxu1 }
 0x63f   :  { %3041 = vtanh.f32 %v717_v48  ;;  %v2637_v62 = vmul.f32 -1.442695, %v717_v48 }
 0x64c   :  { %v3042_v53 = vpop.eup %3041 }
 0x64d   :  { %804 = vrot.lane.b32.xlu1 %v3042_v53, %s3239_s0 }
 0x65a   :  { %v791_v55 = vpop.f32.mrf.mxu1 }
 0x65b   :  { %v792_v56 = vadd.f32 %v791_v55, %v3467_v61 }
 0x65c   :  { %v2840_v58 = vpop.f32.mrf.mxu1 }
 0x65d   :  { %3043 = vtanh.f32 %v792_v56  ;;  %v2638_v6 = vmul.f32 -1.442695, %v792_v56 }
 0x65e   :  { %3045 = vpow2.f32 %v2637_v62 }
 0x66a   :  { %v3044_v60 = vpop.eup %3043 }
 0x66b   :  { %828 = vrot.lane.b32.xlu0 %v3044_v60, %s3239_s0  ;;  %v3046_v1 = vpop.eup %3045 }
 0x66c   :  { %v798_v3 = vadd.f32 1.0, %v3046_v1 }
 0x66e   :  { %3047 = vrcp.f32 %v798_v3 }
 0x66f   :  { %3049 = vpow2.f32 %v2638_v6 }
 0x67b   :  { %v3048_v44 = vpop.eup %3047 }
 0x67c   :  { %v3050_v11 = vpop.eup %3049  ;;  %v802_v18 = vmul.f32 %v3048_v44, %v3521_v30 }
 0x67d   :  { %v822_v13 = vadd.f32 1.0, %v3050_v11 }
 0x67f   :  { %3051 = vrcp.f32 %v822_v13 }
 0x68c   :  { %v3052_v61 = vpop.eup %3051 }
 0x68d   :  { %v826_v22 = vmul.f32 %v3052_v61, %v3526_v34 }
 0x6bf   :  { %v805_v8 = vpop.permute.xlu1 %804 }
 0x6c0   :  { %v807_v10 = vmul.f32 %v3048_v44, %v805_v8 }
 0x6c2   :  { %809 = vrot.lane.b32.xlu1 %v807_v10, %s3240_s2 }
 0x6dd   :  { %v829_v40 = vpop.permute.xlu0 %828 }
 0x6de   :  { %v831_v15 = vmul.f32 %v3052_v61, %v829_v40 }
 0x6e0   :  { %833 = vrot.lane.b32.xlu0 %v831_v15, %s3240_s2 }
 0x734   :  { %v810_v20 = vpop.permute.xlu1 %809 }
 0x735   :  { %v3565_v21 = vadd.f32 %v810_v20, %v802_v18 }
 0x737   :  { %3053 = vtanh.f32 %v3565_v21 }
 0x744   :  { %v3054_v2 = vpop.eup %3053 }
 0x745   :  { %815 = vrot.lane.b32.xlu1 %v3054_v2, %s3239_s0 }
 0x752   :  { %v834_v23 = vpop.permute.xlu0 %833 }
 0x753   :  { %v3570_v24 = vadd.f32 %v834_v23, %v826_v22 }
 0x755   :  { %3055 = vtanh.f32 %v3570_v24 }
 0x762   :  { %v3056_v28 = vpop.eup %3055 }
 0x763   :  { %839 = vrot.lane.b32.xlu0 %v3056_v28, %s3239_s0 }
 0x7b7   :  { %v816_v31 = vpop.permute.xlu1 %815 }
 0x7b8   :  { %v818_v30 = vmul.f32 %v3048_v44, %v816_v31 }
 0x7ba   :  { %844 = vrot.lane.b32.xlu1 %v818_v30, %s3240_s2 }
 0x7d5   :  { %v840_v32 = vpop.permute.xlu0 %839 }
 0x7d6   :  { %v3575_v33 = vmul.f32 %v3052_v61, %v840_v32 }
 0x7d8   :  { %927 = vrot.lane.b32.xlu0 %v3575_v33, %s3240_s2 }
 0x82c   :  { %v845_v36 = vpop.permute.xlu1 %844 }
 0x82d   :  { %847 = vst.msk [vmem:[#allocation3 + $0x10] sm:$0xff] %vm75_vm1, %v845_v36  ;;  %2850 = vmatmul.mubr.msk.f32.vlgmr.msra.gmra.mxu0 %vm75_vm1, %v845_v36 }
 0x82e   :  { %2864 = vmatpush3.msra.mxu0 %v3315_v5  ;;  %2871 = vmatprep.mubr.msk.f32.mxu0 %vm3238_vm0, %v3237_v0 }
 0x82f   :  { %2865 = vmatprep.subr.mxu0 %v3237_v0 }
 0x830   :  { %2866 = vmatpush3.msra.mxu0 %v3324_v7 }
 0x831   :  { %2867 = vmatprep.subr.mxu0 %v3237_v0 }
 0x832   :  { %2868 = vmatpush3.msra.mxu0 %v3333_v9 }
 0x833   :  { %2869 = vmatprep.subr.mxu0 %v3237_v0 }
 0x834   :  { %2870 = vmatpush3.msra.mxu0 %v3346_v12 }
 0x835   :  { %2885 = vmatprep.subr.mxu0 %v3237_v0 }
 0x84a   :  { %v928_v34 = vpop.permute.xlu0 %927 }
 0x84b   :  { %2861 = vmatmul.mubr.msk.f32.vlgmr.msra.gmra.mxu1 %vm75_vm1, %v928_v34 }
 0x84c   :  { %2875 = vmatpush3.msra.mxu1 %v3354_v14  ;;  %2882 = vmatprep.mubr.msk.f32.mxu1 %vm3238_vm0, %v3237_v0 }
 0x84d   :  { %2876 = vmatprep.subr.mxu1 %v3237_v0 }
 0x84e   :  { %2877 = vmatpush3.msra.mxu1 %v3363_v16 }
 0x84f   :  { %2878 = vmatprep.subr.mxu1 %v3237_v0 }
 0x850   :  { %2879 = vmatpush3.msra.mxu1 %v3369_v17 }
 0x851   :  { %2880 = vmatprep.subr.mxu1 %v3237_v0 }
 0x852   :  { %2881 = vmatpush3.msra.mxu1 %v3379_v19 }
 0x853   :  { %2896 = vmatprep.subr.mxu1 %v3237_v0 }
 0x8ed   :  { %v922_v38 = vpop.f32.mrf.mxu0 }
 0x8ee   :  { %v923_v35 = vadd.f32 %v922_v38, %v3456_v50 }
 0x8ef   :  { %v2851_v39 = vpop.f32.mrf.mxu0 }
 0x8f0   :  { %3057 = vtanh.f32 %v923_v35  ;;  %v2641_v53 = vmul.f32 -1.442695, %v923_v35 }
 0x8fd   :  { %v3058_v45 = vpop.eup %3057 }
 0x8fe   :  { %1010 = vrot.lane.b32.xlu1 %v3058_v45, %s3239_s0 }
 0x90b   :  { %v997_v41 = vpop.f32.mrf.mxu1 }
 0x90c   :  { %v998_v46 = vadd.f32 %v997_v41, %v3462_v57 }
 0x90d   :  { %v2862_v48 = vpop.f32.mrf.mxu1 }
 0x90e   :  { %3059 = vtanh.f32 %v998_v46  ;;  %v2642_v58 = vmul.f32 -1.442695, %v998_v46 }
 0x90f   :  { %3061 = vpow2.f32 %v2641_v53 }
 0x91b   :  { %v3060_v51 = vpop.eup %3059 }
 0x91c   :  { %1034 = vrot.lane.b32.xlu0 %v3060_v51, %s3239_s0  ;;  %v3062_v55 = vpop.eup %3061 }
 0x91d   :  { %v1004_v56 = vadd.f32 1.0, %v3062_v55 }
 0x91f   :  { %3063 = vrcp.f32 %v1004_v56 }
 0x920   :  { %3065 = vpow2.f32 %v2642_v58 }
 0x92c   :  { %v3064_v50 = vpop.eup %3063 }
 0x92d   :  { %v3066_v1 = vpop.eup %3065  ;;  %v1008_v8 = vmul.f32 %v3064_v50, %v3565_v21 }
 0x92e   :  { %v1028_v3 = vadd.f32 1.0, %v3066_v1 }
 0x930   :  { %3067 = vrcp.f32 %v1028_v3 }
 0x93d   :  { %v3068_v57 = vpop.eup %3067 }
 0x93e   :  { %v1032_v61 = vmul.f32 %v3068_v57, %v3570_v24 }
 0x970   :  { %v1011_v60 = vpop.permute.xlu1 %1010 }
 0x971   :  { %v1013_v62 = vmul.f32 %v3064_v50, %v1011_v60 }
 0x973   :  { %1015 = vrot.lane.b32.xlu1 %v1013_v62, %s3240_s2 }
 0x98e   :  { %v1035_v6 = vpop.permute.xlu0 %1034 }
 0x98f   :  { %v1037_v44 = vmul.f32 %v3068_v57, %v1035_v6 }
 0x991   :  { %1039 = vrot.lane.b32.xlu0 %v1037_v44, %s3240_s2 }
 0x9e5   :  { %v1016_v10 = vpop.permute.xlu1 %1015 }
 0x9e6   :  { %v3609_v11 = vadd.f32 %v1016_v10, %v1008_v8 }
 0x9e8   :  { %3069 = vtanh.f32 %v3609_v11 }
 0x9f5   :  { %v3070_v13 = vpop.eup %3069 }
 0x9f6   :  { %1021 = vrot.lane.b32.xlu1 %v3070_v13, %s3239_s0 }
 0xa03   :  { %v1040_v40 = vpop.permute.xlu0 %1039 }
 0xa04   :  { %v3614_v15 = vadd.f32 %v1040_v40, %v1032_v61 }
 0xa06   :  { %3071 = vtanh.f32 %v3614_v15 }
 0xa13   :  { %v3072_v18 = vpop.eup %3071 }
 0xa14   :  { %1045 = vrot.lane.b32.xlu0 %v3072_v18, %s3239_s0 }
 0xa68   :  { %v1022_v20 = vpop.permute.xlu1 %1021 }
 0xa69   :  { %v1024_v21 = vmul.f32 %v3064_v50, %v1022_v20 }
 0xa6b   :  { %1050 = vrot.lane.b32.xlu1 %v1024_v21, %s3240_s2 }
 0xa86   :  { %v1046_v2 = vpop.permute.xlu0 %1045 }
 0xa87   :  { %v3619_v22 = vmul.f32 %v3068_v57, %v1046_v2 }
 0xa89   :  { %1133 = vrot.lane.b32.xlu0 %v3619_v22, %s3240_s2 }
 0xadd   :  { %v1051_v23 = vpop.permute.xlu1 %1050 }
 0xade   :  { %1053 = vst.msk [vmem:[#allocation3 + $0x18] sm:$0xff] %vm75_vm1, %v1051_v23  ;;  %2872 = vmatmul.mubr.msk.f32.vlgmr.msra.gmra.mxu0 %vm75_vm1, %v1051_v23 }
 0xadf   :  { %2886 = vmatpush3.msra.mxu0 %v3315_v5  ;;  %2893 = vmatprep.mubr.msk.f32.mxu0 %vm3238_vm0, %v3237_v0 }
 0xae0   :  { %2887 = vmatprep.subr.mxu0 %v3237_v0 }
 0xae1   :  { %2888 = vmatpush3.msra.mxu0 %v3324_v7 }
 0xae2   :  { %2889 = vmatprep.subr.mxu0 %v3237_v0 }
 0xae3   :  { %2890 = vmatpush3.msra.mxu0 %v3333_v9 }
 0xae4   :  { %2891 = vmatprep.subr.mxu0 %v3237_v0 }
 0xae5   :  { %2892 = vmatpush3.msra.mxu0 %v3346_v12 }
 0xae6   :  { %2907 = vmatprep.subr.mxu0 %v3237_v0 }
 0xafb   :  { %v1134_v24 = vpop.permute.xlu0 %1133 }
 0xafc   :  { %2883 = vmatmul.mubr.msk.f32.vlgmr.msra.gmra.mxu1 %vm75_vm1, %v1134_v24 }
 0xafd   :  { %2897 = vmatpush3.msra.mxu1 %v3354_v14  ;;  %2904 = vmatprep.mubr.msk.f32.mxu1 %vm3238_vm0, %v3237_v0 }
 0xafe   :  { %2898 = vmatprep.subr.mxu1 %v3237_v0 }
 0xaff   :  { %2899 = vmatpush3.msra.mxu1 %v3363_v16 }
 0xb00   :  { %2900 = vmatprep.subr.mxu1 %v3237_v0 }
 0xb01   :  { %2901 = vmatpush3.msra.mxu1 %v3369_v17 }
 0xb02   :  { %2902 = vmatprep.subr.mxu1 %v3237_v0 }
 0xb03   :  { %2903 = vmatpush3.msra.mxu1 %v3379_v19 }
 0xb04   :  { %2918 = vmatprep.subr.mxu1 %v3237_v0 }
 0xb9e   :  { %v1128_v28 = vpop.f32.mrf.mxu0 }
 0xb9f   :  { %v1129_v31 = vadd.f32 %v1128_v28, %v3460_v54 }
 0xba0   :  { %v2873_v30 = vpop.f32.mrf.mxu0 }
 0xba1   :  { %3073 = vtanh.f32 %v1129_v31  ;;  %v2645_v39 = vmul.f32 -1.442695, %v1129_v31 }
 0xbae   :  { %v3074_v32 = vpop.eup %3073 }
 0xbaf   :  { %1216 = vrot.lane.b32.xlu1 %v3074_v32, %s3239_s0 }
 0xbbc   :  { %v1203_v36 = vpop.f32.mrf.mxu1 }
 0xbbd   :  { %v1204_v34 = vadd.f32 %v1203_v36, %v3458_v52 }
 0xbbe   :  { %v2884_v38 = vpop.f32.mrf.mxu1 }
 0xbbf   :  { %3075 = vtanh.f32 %v1204_v34  ;;  %v2646_v46 = vmul.f32 -1.442695, %v1204_v34 }
 0xbc0   :  { %3077 = vpow2.f32 %v2645_v39 }
 0xbcc   :  { %v3076_v35 = vpop.eup %3075 }
 0xbcd   :  { %1240 = vrot.lane.b32.xlu0 %v3076_v35, %s3239_s0  ;;  %v3078_v45 = vpop.eup %3077 }
 0xbce   :  { %v1210_v41 = vadd.f32 1.0, %v3078_v45 }
 0xbd0   :  { %3079 = vrcp.f32 %v1210_v41 }
 0xbd1   :  { %3081 = vpow2.f32 %v2646_v46 }
 0xbdd   :  { %v3080_v54 = vpop.eup %3079 }
 0xbde   :  { %v3082_v53 = vpop.eup %3081  ;;  %v1214_v50 = vmul.f32 %v3080_v54, %v3609_v11 }
 0xbdf   :  { %v1234_v55 = vadd.f32 1.0, %v3082_v53 }
 0xbe1   :  { %3083 = vrcp.f32 %v1234_v55 }
 0xbee   :  { %v3084_v52 = vpop.eup %3083 }
 0xbef   :  { %v1238_v3 = vmul.f32 %v3084_v52, %v3614_v15 }
 0xc21   :  { %v1217_v48 = vpop.permute.xlu1 %1216 }
 0xc22   :  { %v1219_v51 = vmul.f32 %v3080_v54, %v1217_v48 }
 0xc24   :  { %1221 = vrot.lane.b32.xlu1 %v1219_v51, %s3240_s2 }
 0xc3f   :  { %v1241_v56 = vpop.permute.xlu0 %1240 }
 0xc40   :  { %v1243_v58 = vmul.f32 %v3084_v52, %v1241_v56 }
 0xc42   :  { %1245 = vrot.lane.b32.xlu0 %v1243_v58, %s3240_s2  ;;  %v3185_v58 = vld [vmem:[%s4043_s3 + $0x18] sm:$0xff] }
 0xc96   :  { %v1222_v60 = vpop.permute.xlu1 %1221 }
 0xc97   :  { %v3653_v62 = vadd.f32 %v1222_v60, %v1214_v50  ;;  %v3186_v50 = vld [vmem:[%s4043_s3 + $0x10] sm:$0xff]  ;;  %v3187_v60 = vld [vmem:[%s4043_s3 + $0x8] sm:$0xff] }
 0xc99   :  { %3085 = vtanh.f32 %v3653_v62 }
 0xca6   :  { %v3086_v1 = vpop.eup %3085 }
 0xca7   :  { %1227 = vrot.lane.b32.xlu1 %v3086_v1, %s3239_s0 }
 0xcb4   :  { %v1246_v57 = vpop.permute.xlu0 %1245 }
 0xcb5   :  { %v3658_v6 = vadd.f32 %v1246_v57, %v1238_v3  ;;  %v3189_v3 = vld [vmem:[#allocation4 + $0x18] sm:$0xff] }
 0xcb7   :  { %3087 = vtanh.f32 %v3658_v6 }
 0xcc4   :  { %v3088_v44 = vpop.eup %3087 }
 0xcc5   :  { %1251 = vrot.lane.b32.xlu0 %v3088_v44, %s3239_s0 }
 0xd19   :  { %v1228_v8 = vpop.permute.xlu1 %1227 }
 0xd1a   :  { %v1230_v10 = vmul.f32 %v3080_v54, %v1228_v8 }
 0xd1c   :  { %1256 = vrot.lane.b32.xlu1 %v1230_v10, %s3240_s2 }
 0xd37   :  { %v1252_v11 = vpop.permute.xlu0 %1251 }
 0xd38   :  { %v3663_v13 = vmul.f32 %v3084_v52, %v1252_v11 }
 0xd3a   :  { %1339 = vrot.lane.b32.xlu0 %v3663_v13, %s3240_s2 }
 0xd8e   :  { %v3667_v61 = vpop.permute.xlu1 %1256 }
 0xd8f   :  { %2894 = vmatmul.mubr.msk.f32.vlgmr.msra.gmra.mxu0 %vm75_vm1, %v3667_v61 }
 0xd90   :  { %2908 = vmatpush3.msra.mxu0 %v3315_v5  ;;  %2915 = vmatprep.mubr.msk.f32.mxu0 %vm3238_vm0, %v3237_v0 }
 0xd91   :  { %2909 = vmatprep.subr.mxu0 %v3237_v0 }
 0xd92   :  { %2910 = vmatpush3.msra.mxu0 %v3324_v7 }
 0xd93   :  { %2911 = vmatprep.subr.mxu0 %v3237_v0 }
 0xd94   :  { %2912 = vmatpush3.msra.mxu0 %v3333_v9 }
 0xd95   :  { %2913 = vmatprep.subr.mxu0 %v3237_v0 }
 0xd96   :  { %2914 = vmatpush3.msra.mxu0 %v3346_v12 }
 0xd97   :  { %2929 = vmatprep.subr.mxu0 %v3237_v0 }
 0xdac   :  { %v1340_v40 = vpop.permute.xlu0 %1339 }
 0xdad   :  { %2905 = vmatmul.mubr.msk.f32.vlgmr.msra.gmra.mxu1 %vm75_vm1, %v1340_v40 }
 0xdae   :  { %2919 = vmatpush3.msra.mxu1 %v3354_v14  ;;  %2926 = vmatprep.mubr.msk.f32.mxu1 %vm3238_vm0, %v3237_v0 }
 0xdaf   :  { %2920 = vmatprep.subr.mxu1 %v3237_v0 }
 0xdb0   :  { %2921 = vmatpush3.msra.mxu1 %v3363_v16 }
 0xdb1   :  { %2922 = vmatprep.subr.mxu1 %v3237_v0 }
 0xdb2   :  { %2923 = vmatpush3.msra.mxu1 %v3369_v17 }
 0xdb3   :  { %2924 = vmatprep.subr.mxu1 %v3237_v0 }
 0xdb4   :  { %2925 = vmatpush3.msra.mxu1 %v3379_v19 }
 0xdb5   :  { %2940 = vmatprep.subr.mxu1 %v3237_v0 }
 0xe4f   :  { %v1334_v5 = vpop.f32.mrf.mxu0 }
 0xe50   :  { %v1335_v7 = vadd.f32 %v1334_v5, %v3465_v59 }
 0xe51   :  { %v2895_v9 = vpop.f32.mrf.mxu0 }
 0xe52   :  { %3089 = vtanh.f32 %v1335_v7  ;;  %v2649_v21 = vmul.f32 -1.442695, %v1335_v7 }
 0xe5f   :  { %v3090_v12 = vpop.eup %3089 }
 0xe60   :  { %1422 = vrot.lane.b32.xlu1 %v3090_v12, %s3239_s0 }
 0xe6d   :  { %v1409_v14 = vpop.f32.mrf.mxu1 }
 0xe6e   :  { %v1410_v15 = vadd.f32 %v1409_v14, %v3454_v47 }
 0xe6f   :  { %v2906_v18 = vpop.f32.mrf.mxu1 }
 0xe70   :  { %3091 = vtanh.f32 %v1410_v15  ;;  %v2650_v24 = vmul.f32 -1.442695, %v1410_v15 }
 0xe71   :  { %3093 = vpow2.f32 %v2649_v21 }
 0xe7d   :  { %v3092_v20 = vpop.eup %3091 }
 0xe7e   :  { %1446 = vrot.lane.b32.xlu0 %v3092_v20, %s3239_s0  ;;  %v3094_v2 = vpop.eup %3093 }
 0xe7f   :  { %v1416_v23 = vadd.f32 1.0, %v3094_v2 }
 0xe81   :  { %3095 = vrcp.f32 %v1416_v23 }
 0xe82   :  { %3097 = vpow2.f32 %v2650_v24 }
 0xe8e   :  { %v3096_v59 = vpop.eup %3095 }
 0xe8f   :  { %v3098_v30 = vpop.eup %3097  ;;  %v1420_v38 = vmul.f32 %v3096_v59, %v3653_v62  ;;  %v3188_v62 = vld [vmem:[%s4043_s3] sm:$0xff] }
 0xe90   :  { %v1440_v32 = vadd.f32 1.0, %v3098_v30 }
 0xe92   :  { %3099 = vrcp.f32 %v1440_v32 }
 0xe9f   :  { %v3100_v47 = vpop.eup %3099 }
 0xea0   :  { %v1444_v41 = vmul.f32 %v3100_v47, %v3658_v6 }
 0xed2   :  { %v1423_v28 = vpop.permute.xlu1 %1422 }
 0xed3   :  { %v1425_v31 = vmul.f32 %v3096_v59, %v1423_v28 }
 0xed5   :  { %1427 = vrot.lane.b32.xlu1 %v1425_v31, %s3240_s2 }
 0xef0   :  { %v1447_v36 = vpop.permute.xlu0 %1446 }
 0xef1   :  { %v1449_v34 = vmul.f32 %v3100_v47, %v1447_v36 }
 0xef3   :  { %1451 = vrot.lane.b32.xlu0 %v1449_v34, %s3240_s2 }
 0xf47   :  { %v1428_v35 = vpop.permute.xlu1 %1427 }
 0xf48   :  { %v3699_v39 = vadd.f32 %v1428_v35, %v1420_v38 }
 0xf4a   :  { %3101 = vtanh.f32 %v3699_v39 }
 0xf57   :  { %v3102_v45 = vpop.eup %3101 }
 0xf58   :  { %1433 = vrot.lane.b32.xlu1 %v3102_v45, %s3239_s0 }
 0xf65   :  { %v1452_v46 = vpop.permute.xlu0 %1451 }
 0xf66   :  { %v3704_v54 = vadd.f32 %v1452_v46, %v1444_v41 }
 0xf68   :  { %3103 = vtanh.f32 %v3704_v54 }
 0xf75   :  { %v3104_v48 = vpop.eup %3103 }
 0xf76   :  { %1457 = vrot.lane.b32.xlu0 %v3104_v48, %s3239_s0 }
 0xfca   :  { %v1434_v51 = vpop.permute.xlu1 %1433 }
 0xfcb   :  { %v1436_v53 = vmul.f32 %v3096_v59, %v1434_v51 }
 0xfcd   :  { %1462 = vrot.lane.b32.xlu1 %v1436_v53, %s3240_s2 }
 0xfe8   :  { %v1458_v55 = vpop.permute.xlu0 %1457 }
 0xfe9   :  { %v3709_v52 = vmul.f32 %v3100_v47, %v1458_v55 }
 0xfeb   :  { %1545 = vrot.lane.b32.xlu0 %v3709_v52, %s3240_s2 }
0x103f   :  { %v3713_v56 = vpop.permute.xlu1 %1462 }
0x1040   :  { %2916 = vmatmul.mubr.msk.f32.vlgmr.msra.gmra.mxu0 %vm75_vm1, %v3713_v56 }
0x1041   :  { %2930 = vmatpush3.msra.mxu0 %v3185_v58  ;;  %2937 = vmatprep.mubr.msk.f32.mxu0 %vm3238_vm0, %v3237_v0 }
0x1042   :  { %2931 = vmatprep.subr.mxu0 %v3237_v0 }
0x1043   :  { %2932 = vmatpush3.msra.mxu0 %v3186_v50 }
0x1044   :  { %2933 = vmatprep.subr.mxu0 %v3237_v0 }
0x1045   :  { %2934 = vmatpush3.msra.mxu0 %v3187_v60 }
0x1046   :  { %2935 = vmatprep.subr.mxu0 %v3237_v0 }
0x1047   :  { %2936 = vmatpush3.msra.mxu0 %v3188_v62 }
0x105d   :  { %v1546_v1 = vpop.permute.xlu0 %1545 }
0x105e   :  { %2927 = vmatmul.mubr.msk.f32.vlgmr.msra.gmra.mxu1 %vm75_vm1, %v1546_v1 }
0x105f   :  { %2941 = vmatpush3.msra.mxu1 %v3189_v3  ;;  %2948 = vmatprep.mubr.msk.f32.mxu1 %vm3238_vm0, %v3237_v0 }
0x1060   :  { %2942 = vmatprep.subr.mxu1 %v3237_v0 }
0x1061   :  { %2943 = vmatpush3.msra.mxu1 %v3363_v16 }
0x1062   :  { %2944 = vmatprep.subr.mxu1 %v3237_v0 }
0x1063   :  { %2945 = vmatpush3.msra.mxu1 %v3369_v17 }
0x1064   :  { %2946 = vmatprep.subr.mxu1 %v3237_v0 }
0x1065   :  { %2947 = vmatpush3.msra.mxu1 %v3379_v19 }
0x1066   :  { %2979 = vmatprep.subr.mxu1 %v3237_v0 }
0x1100   :  { %v1540_v57 = vpop.f32.mrf.mxu0 }
0x1101   :  { %v1541_v6 = vadd.f32 %v1540_v57, %v3469_v63 }
0x1102   :  { %v2917_v44 = vpop.f32.mrf.mxu0 }
0x1103   :  { %3105 = vtanh.f32 %v1541_v6  ;;  %v2653_v40 = vmul.f32 -1.442695, %v1541_v6 }
0x1110   :  { %v3106_v8 = vpop.eup %3105 }
0x1111   :  { %1628 = vrot.lane.b32.xlu1 %v3106_v8, %s3239_s0 }
0x111e   :  { %v1615_v10 = vpop.f32.mrf.mxu1 }
0x111f   :  { %v1616_v16 = vadd.f32 %v1615_v10, %v3450_v42 }
0x1120   :  { %v2928_v11 = vpop.f32.mrf.mxu1 }
0x1121   :  { %3107 = vtanh.f32 %v1616_v16  ;;  %v2654_v7 = vmul.f32 -1.442695, %v1616_v16 }
0x1122   :  { %3109 = vpow2.f32 %v2653_v40 }
0x112e   :  { %v3108_v17 = vpop.eup %3107 }
0x112f   :  { %1652 = vrot.lane.b32.xlu0 %v3108_v17, %s3239_s0  ;;  %v3110_v19 = vpop.eup %3109 }
0x1130   :  { %v1622_v5 = vadd.f32 1.0, %v3110_v19 }
0x1132   :  { %3111 = vrcp.f32 %v1622_v5 }
0x1133   :  { %3113 = vpow2.f32 %v2654_v7  ;;  %v1898_v7 = vld [vmem:[%s4045_s5 + $0x38] sm:$0xff] }
0x1134   :  { %2951 = vmatprep.subr.mxu0 %v1898_v7 }
0x113f   :  { %v3112_v63 = vpop.eup %3111 }
0x1140   :  { %v3114_v14 = vpop.eup %3113  ;;  %v1626_v21 = vmul.f32 %v3112_v63, %v3699_v39 }
0x1141   :  { %v1646_v15 = vadd.f32 1.0, %v3114_v14 }
0x1143   :  { %3115 = vrcp.f32 %v1646_v15 }
0x1150   :  { %v3116_v42 = vpop.eup %3115 }
0x1151   :  { %v1650_v59 = vmul.f32 %v3116_v42, %v3704_v54 }
0x1183   :  { %v1629_v9 = vpop.permute.xlu1 %1628 }
0x1184   :  { %v1631_v12 = vmul.f32 %v3112_v63, %v1629_v9 }
0x1186   :  { %1633 = vrot.lane.b32.xlu1 %v1631_v12, %s3240_s2 }
0x11a1   :  { %v1653_v18 = vpop.permute.xlu0 %1652 }
0x11a2   :  { %v1655_v20 = vmul.f32 %v3116_v42, %v1653_v18  ;;  %v1893_v18 = vld [vmem:[%s4045_s5 + $0x10] sm:$0xff] }
0x11a4   :  { %1657 = vrot.lane.b32.xlu0 %v1655_v20, %s3240_s2  ;;  %v1892_v20 = vld [vmem:[%s4045_s5 + $0x8] sm:$0xff] }
0x11f8   :  { %v1634_v2 = vpop.permute.xlu1 %1633 }
0x11f9   :  { %v1636_v23 = vadd.f32 %v1634_v2, %v1626_v21 }
0x11fb   :  { %3117 = vtanh.f32 %v1636_v23 }
0x1208   :  { %v3118_v24 = vpop.eup %3117 }
0x1209   :  { %1639 = vrot.lane.b32.xlu1 %v3118_v24, %s3239_s0 }
0x1216   :  { %v1658_v28 = vpop.permute.xlu0 %1657 }
0x1217   :  { %v1660_v31 = vadd.f32 %v1658_v28, %v1650_v59 }
0x1219   :  { %3119 = vtanh.f32 %v1660_v31 }
0x1226   :  { %v3120_v30 = vpop.eup %3119 }
0x1227   :  { %1663 = vrot.lane.b32.xlu0 %v3120_v30, %s3239_s0 }
0x127b   :  { %v1640_v32 = vpop.permute.xlu1 %1639 }
0x127c   :  { %v1642_v47 = vmul.f32 %v3112_v63, %v1640_v32 }
0x127e   :  { %1668 = vrot.lane.b32.xlu1 %v1642_v47, %s3240_s2 }
0x1299   :  { %v1664_v36 = vpop.permute.xlu0 %1663 }
0x129a   :  { %v1666_v34 = vmul.f32 %v3116_v42, %v1664_v36  ;;  %v1894_v42 = vld [vmem:[%s4045_s5 + $0x18] sm:$0xff] }
0x129c   :  { %1751 = vrot.lane.b32.xlu0 %v1666_v34, %s3240_s2 }
0x12f0   :  { %v3756_v38 = vpop.permute.xlu1 %1668 }
0x12f1   :  { %2938 = vmatmul.mubr.msk.f32.vlgmr.msra.gmra.mxu0 %vm75_vm1, %v3756_v38 }
0x12f2   :  { %2952 = vmatpush3.msra.mxu0 %v1898_v7 }
0x130e   :  { %v1752_v35 = vpop.permute.xlu0 %1751 }
0x130f   :  { %2949 = vmatmul.mubr.msk.f32.vlgmr.msra.gmra.mxu1 %vm75_vm1, %v1752_v35 }
0x1310   :  { %2995 = vmatprep.mubr.msk.f32.mxu1 %vm3238_vm0, %v3237_v0 }
0x13b1   :  { %v1746_v39 = vpop.f32.mrf.mxu0 }
0x13b2   :  { %v1747_v45 = vadd.f32 %v1746_v39, %v3473_v4 }
0x13b3   :  { %v2939_v41 = vpop.f32.mrf.mxu0 }
0x13b4   :  { %3121 = vtanh.f32 %v1747_v45  ;;  %v2657_v55 = vmul.f32 -1.442695, %v1747_v45 }
0x13c1   :  { %v3122_v46 = vpop.eup %3121 }
0x13c2   :  { %1834 = vrot.lane.b32.xlu1 %v3122_v46, %s3239_s0 }
0x13cf   :  { %v1821_v54 = vpop.f32.mrf.mxu1 }
0x13d0   :  { %v1822_v48 = vadd.f32 %v1821_v54, %v3446_v37  ;;  %v2667_v54 = vld [vmem:[%s4046_s6] ss:$0 sm:$0xff] }
0x13d1   :  { %v2950_v51 = vpop.f32.mrf.mxu1 }
0x13d2   :  { %3123 = vtanh.f32 %v1822_v48  ;;  %v2658_v60 = vmul.f32 -1.442695, %v1822_v48 }
0x13d3   :  { %3125 = vpow2.f32 %v2657_v55 }
0x13df   :  { %v3124_v53 = vpop.eup %3123 }
0x13e0   :  { %1858 = vrot.lane.b32.xlu0 %v3124_v53, %s3239_s0  ;;  %v3126_v58 = vpop.eup %3125 }
0x13e1   :  { %v1828_v50 = vadd.f32 1.0, %v3126_v58 }
0x13e3   :  { %3127 = vrcp.f32 %v1828_v50 }
0x13e4   :  { %3129 = vpow2.f32 %v2658_v60 }
0x13f0   :  { %v3767_v4 = vpop.eup %3127 }
0x13f1   :  { %v3130_v37 = vpop.eup %3129  ;;  %v1832_v8 = vmul.f32 %v3767_v4, %v1636_v23 }
0x13f2   :  { %v1852_v3 = vadd.f32 1.0, %v3130_v37 }
0x13f4   :  { %3131 = vrcp.f32 %v1852_v3 }
0x1401   :  { %v3132_v57 = vpop.eup %3131 }
0x1402   :  { %v1856_v17 = vmul.f32 %v3132_v57, %v1660_v31 }
0x1434   :  { %v1835_v62 = vpop.permute.xlu1 %1834 }
0x1435   :  { %v1837_v1 = vmul.f32 %v3767_v4, %v1835_v62 }
0x1437   :  { %1839 = vrot.lane.b32.xlu1 %v1837_v1, %s3240_s2 }
0x1452   :  { %v1859_v6 = vpop.permute.xlu0 %1858 }
0x1453   :  { %v1861_v44 = vmul.f32 %v3132_v57, %v1859_v6 }
0x1455   :  { %1863 = vrot.lane.b32.xlu0 %v1861_v44, %s3240_s2 }
0x14a9   :  { %v1840_v10 = vpop.permute.xlu1 %1839 }
0x14aa   :  { %v1842_v16 = vadd.f32 %v1840_v10, %v1832_v8 }
0x14ac   :  { %3133 = vtanh.f32 %v1842_v16 }
0x14b9   :  { %v3134_v11 = vpop.eup %3133 }
0x14ba   :  { %1845 = vrot.lane.b32.xlu1 %v3134_v11, %s3239_s0 }
0x14be   :  { %1673 = vrot.lane.b32.xlu1 %v1666_v34, %s3239_s0 }
0x14c2   :  { %1261 = vrot.lane.b32.xlu1 %v3663_v13, %s3239_s0  ;;  %v1897_v13 = vld [vmem:[%s4045_s5 + $0x30] sm:$0xff] }
0x14c3   :  { %2953 = vmatprep.subr.mxu0 %v1897_v13 }
0x14c4   :  { %2954 = vmatpush3.msra.mxu0 %v1897_v13 }
0x14c6   :  { %849 = vrot.lane.b32.xlu1 %v3575_v33, %s3239_s0  ;;  %v1896_v33 = vld [vmem:[%s4045_s5 + $0x28] sm:$0xff] }
0x14c7   :  { %v1864_v40 = vpop.permute.xlu0 %1863  ;;  %2955 = vmatprep.subr.mxu0 %v1896_v33 }
0x14c8   :  { %v1866_v19 = vadd.f32 %v1864_v40, %v1856_v17  ;;  %2956 = vmatpush3.msra.mxu0 %v1896_v33 }
0x14ca   :  { %3135 = vtanh.f32 %v1866_v19  ;;  %436 = vrot.lane.b32.xlu1 %v3487_v49, %s3239_s0  ;;  %v1895_v49 = vld [vmem:[%s4045_s5 + $0x20] sm:$0xff] }
0x14cb   :  { %2957 = vmatprep.subr.mxu0 %v1895_v49 }
0x14cc   :  { %2958 = vmatpush3.msra.mxu0 %v1895_v49  ;;  %v2085_v49 = vand.u32 127, %v65_v25 }
0x14cd   :  { %2959 = vmatprep.subr.mxu0 %v1894_v42 }
0x14ce   :  { %2960 = vmatpush3.msra.mxu0 %v1894_v42 }
0x14cf   :  { %2961 = vmatprep.subr.mxu0 %v1893_v18 }
0x14d0   :  { %2962 = vmatpush3.msra.mxu0 %v1893_v18 }
0x14d1   :  { %2963 = vmatprep.subr.mxu0 %v1892_v20 }
0x14d2   :  { %2964 = vmatpush3.msra.mxu0 %v1892_v20 }
0x14d7   :  { %v3136_v5 = vpop.eup %3135 }
0x14d8   :  { %1869 = vrot.lane.b32.xlu0 %v3136_v5, %s3239_s0 }
0x152c   :  { %v1846_v63 = vpop.permute.xlu1 %1845 }
0x152d   :  { %v1848_v23 = vmul.f32 %v3767_v4, %v1846_v63 }
0x1530   :  { %v1674_v9 = vpop.permute.xlu1 %1673 }
0x1531   :  { %1676 = vst.msk [vmem:[#allocation3 + $0x8] sm:$0xff] %vm439_vm2, %v1674_v9 }
0x1534   :  { %v1262_v12 = vpop.permute.xlu1 %1261 }
0x1535   :  { %1264 = vst.msk [vmem:[#allocation3 + $0x18] sm:$0xff] %vm439_vm2, %v1262_v12  ;;  %v3875_v12 = vsub.s32 %v2085_v49, %v3433_v26 }
0x1538   :  { %v850_v14 = vpop.permute.xlu1 %849 }
0x1539   :  { %852 = vst.msk [vmem:[#allocation3 + $0x28] sm:$0xff] %vm439_vm2, %v850_v14 }
0x153a   :  { %1465 = vst.msk [vmem:[#allocation3 + $0x28] sm:$0xff] %vm75_vm1, %v3713_v56  ;;  %v1891_v56 = vld [vmem:[%s4045_s5] sm:$0xff] }
0x153b   :  { %2965 = vmatprep.subr.mxu0 %v1891_v56 }
0x153c   :  { %v437_v15 = vpop.permute.xlu1 %436  ;;  %2966 = vmatpush3.msra.mxu0 %v1891_v56  ;;  %v3839_v30 = vld [vmem:[#allocation3 + $0x18] sm:$0xff] }
0x153d   :  { %440 = vst.msk [vmem:[#allocation3 + $0x38] sm:$0xff] %vm439_vm2, %v437_v15 }
0x1541   :  { %v3850_v47 = vld [vmem:[#allocation3 + $0x28] sm:$0xff] }
0x154a   :  { %v1870_v21 = vpop.permute.xlu0 %1869 }
0x154b   :  { %v1872_v2 = vmul.f32 %v3132_v57, %v1870_v21 }
0x154d   :  { %1879 = vrot.lane.b32.xlu0 %v1872_v2, %s3239_s0 }
0x1551   :  { %1467 = vrot.lane.b32.xlu0 %v3709_v52, %s3239_s0 }
0x1555   :  { %1055 = vrot.lane.b32.xlu0 %v3619_v22, %s3239_s0 }
0x1559   :  { %643 = vrot.lane.b32.xlu0 %v3531_v43, %s3239_s0  ;;  %v3828_v43 = vld [vmem:[#allocation3 + $0x8] sm:$0xff] }
0x155d   :  { %1874 = vrot.lane.b32.xlu0 %v1848_v23, %s3240_s2 }
0x15bf   :  { %v1880_v24 = vpop.permute.xlu0 %1879 }
0x15c0   :  { %1882 = vst.msk [vmem:[#allocation3] sm:$0xff] %vm439_vm2, %v1880_v24 }
0x15c3   :  { %v1468_v59 = vpop.permute.xlu0 %1467 }
0x15c4   :  { %1470 = vst.msk [vmem:[#allocation3 + $0x10] sm:$0xff] %vm439_vm2, %v1468_v59 }
0x15c7   :  { %v1056_v28 = vpop.permute.xlu0 %1055  ;;  %v3823_v31 = vld [vmem:[#allocation3] sm:$0xff] }
0x15c8   :  { %1058 = vst.msk [vmem:[#allocation3 + $0x20] sm:$0xff] %vm439_vm2, %v1056_v28  ;;  %2967 = vmatprep.mubr.msk.f32.mxu0 %vm1899_vm3, %v3823_v31 }
0x15c9   :  { %1259 = vst.msk [vmem:[#allocation3 + $0x20] sm:$0xff] %vm75_vm1, %v3667_v61  ;;  %2968 = vmatmul.mubr.msk.f32.vlgmr.msra.gmra.mxu0 %vm1899_vm3, %v3828_v43 }
0x15cb   :  { %v644_v22 = vpop.permute.xlu0 %643  ;;  %v3834_v52 = vld [vmem:[#allocation3 + $0x10] sm:$0xff] }
0x15cc   :  { %646 = vst.msk [vmem:[#allocation3 + $0x30] sm:$0xff] %vm439_vm2, %v644_v22  ;;  %2970 = vmatprep.mubr.msk.f32.mxu0 %vm1899_vm3, %v3834_v52 }
0x15cd   :  { %1671 = vst.msk [vmem:[#allocation3 + $0x30] sm:$0xff] %vm75_vm1, %v3756_v38  ;;  %2971 = vmatmul.mubr.msk.f32.gmra.mxu0 %vm1899_vm3, %v3839_v30 }
0x15cf   :  { %v1875_v61 = vpop.permute.xlu0 %1874 }
0x15d0   :  { %1877 = vst.msk [vmem:[#allocation3 + $0x38] sm:$0xff] %vm75_vm1, %v1875_v61  ;;  %v3846_v32 = vld [vmem:[#allocation3 + $0x20] sm:$0xff] }
0x15d1   :  { %2973 = vmatprep.mubr.msk.f32.mxu0 %vm1899_vm3, %v3846_v32 }
0x15d2   :  { %2974 = vmatmul.mubr.msk.f32.gmra.mxu0 %vm1899_vm3, %v3850_v47 }
0x15d4   :  { %v3854_v36 = vld [vmem:[#allocation3 + $0x30] sm:$0xff] }
0x15d5   :  { %2976 = vmatprep.mubr.msk.f32.mxu0 %vm1899_vm3, %v3854_v36 }
0x15d7   :  { %v3858_v34 = vld [vmem:[#allocation3 + $0x38] sm:$0xff] }
0x15d8   :  { %2977 = vmatmul.mubr.msk.f32.gmra.mxu0 %vm1899_vm3, %v3858_v34 }
0x1689   :  { %v2969_v38 = vpop.f32.mrf.mxu0 }
0x168a   :  { %3137 = vtanh.f32 %v2969_v38 }
0x168b   :  { %v1990_v35 = vpop.f32.mrf.mxu0 }
0x168c   :  { %3139 = vtanh.f32 %v1990_v35 }
0x168d   :  { %v2972_v39 = vpop.f32.mrf.mxu0 }
0x168e   :  { %3141 = vtanh.f32 %v2972_v39 }
0x168f   :  { %v2000_v45 = vpop.f32.mrf.mxu0 }
0x1690   :  { %3143 = vtanh.f32 %v2000_v45 }
0x1692   :  { %v2975_v41 = vpop.f32.mrf.mxu0 }
0x1693   :  { %3145 = vtanh.f32 %v2975_v41 }
0x1694   :  { %v2010_v46 = vpop.f32.mrf.mxu0 }
0x1695   :  { %3147 = vtanh.f32 %v2010_v46 }
0x1697   :  { %v3138_v48 = vpop.eup %3137 }
0x1698   :  { %v2978_v51 = vpop.f32.mrf.mxu0  ;;  %v2045_v53 = vmul.f32 %v3138_v48, %v2667_v54  ;;  %v3241_v48 = vmov 0  }
0x1699   :  { %v3140_v55 = vpop.eup %3139  ;;  %3149 = vtanh.f32 %v2978_v51  ;;  %3008 = vset.pattern.permute.xlu0 %v3241_v48  ;;  %3007 = vset.pattern.permute.xlu1 %v3241_v48  ;;  %v3894_v51 = vsub.s32 2, %v3433_v26 }
0x169a   :  { %v2020_v58 = vpop.f32.mrf.mxu0  ;;  %v2055_v50 = vsel %vm75_vm1, %v2045_v53, 0.0  ;;  %v2044_v60 = vmul.f32 %v3140_v55, %v2667_v54  ;;  %v3897_v53 = vsub.s32 3, %v3433_v26 }
0x169b   :  { %v3142_v4 = vpop.eup %3141  ;;  %3151 = vtanh.f32 %v2020_v58  ;;  %2056 = vadd.xlane.f32.xlu0 %v2055_v50 }
0x169c   :  { %v2052_v62 = vsel %vm75_vm1, %v2044_v60, 0.0  ;;  %v2047_v1 = vmul.f32 %v3142_v4, %v2667_v54  ;;  %v3903_v4 = vsub.s32 4, %v3433_v26 }
0x169d   :  { %v3144_v37 = vpop.eup %3143  ;;  %2053 = vadd.xlane.f32.xlu1 %v2052_v62 }
0x169e   :  { %v2046_v3 = vmul.f32 %v3144_v37, %v2667_v54  ;;  %v2061_v6 = vsel %vm75_vm1, %v2047_v1, 0.0 }
0x16a0   :  { %v3146_v57 = vpop.eup %3145  ;;  %v2058_v44 = vsel %vm75_vm1, %v2046_v3, 0.0 }
0x16a1   :  { %2062 = vadd.xlane.f32.xlu1 %v2061_v6  ;;  %2059 = vadd.xlane.f32.xlu0 %v2058_v44  ;;  %v2049_v8 = vmul.f32 %v3146_v57, %v2667_v54  ;;  %v3907_v44 = vsub.s32 5, %v3433_v26 }
0x16a2   :  { %v3148_v10 = vpop.eup %3147 }
0x16a3   :  { %v2067_v16 = vsel %vm75_vm1, %v2049_v8, 0.0  ;;  %v2048_v11 = vmul.f32 %v3148_v10, %v2667_v54 }
0x16a5   :  { %2068 = vadd.xlane.f32.xlu1 %v2067_v16  ;;  %v2064_v17 = vsel %vm75_vm1, %v2048_v11, 0.0  ;;  %v3911_v11 = vsub.s32 6, %v3433_v26 }
0x16a6   :  { %v3150_v40 = vpop.eup %3149  ;;  %2065 = vadd.xlane.f32.xlu0 %v2064_v17 }
0x16a7   :  { %v2051_v19 = vmul.f32 %v3150_v40, %v2667_v54 }
0x16a8   :  { %v3152_v5 = vpop.eup %3151 }
0x16a9   :  { %v2073_v7 = vsel %vm75_vm1, %v2051_v19, 0.0  ;;  %v2050_v13 = vmul.f32 %v3152_v5, %v2667_v54  ;;  %v3915_v5 = vsub.s32 7, %v3433_v26 }
0x16aa   :  { %2074 = vadd.xlane.f32.xlu1 %v2073_v7 }
0x16ab   :  { %v2070_v33 = vsel %vm75_vm1, %v2050_v13, 0.0 }
0x16ac   :  { %2071 = vadd.xlane.f32.xlu0 %v2070_v33 }
0x1724   :  { %v2057_v63 = vpop.xlane.xlu0 %2056 }
0x1725   :  { %v2093_v20 = vrot.slane %v2057_v63, %v3875_v12 }
0x1726   :  { %v2054_v9 = vpop.xlane.xlu1 %2053 }
0x1727   :  { %v2089_v42 = vrot.slane %v2054_v9, %v3875_v12 }
0x1729   :  { %v2119_v21 = vsel %vm2118_vm4, %v2093_v20, %v2089_v42 }
0x172a   :  { %v2063_v14 = vpop.xlane.xlu1 %2062  ;;  %v2060_v15 = vpop.xlane.xlu0 %2059 }
0x172b   :  { %v2097_v18 = vrot.slane %v2060_v15, %v3875_v12  ;;  %v2101_v25 = vrot.slane %v2063_v14, %v3875_v12 }
0x172d   :  { %v2121_v23 = vsel %vm2120_vm5, %v2097_v18, %v2119_v21 }
0x172e   :  { %v2069_v56 = vpop.xlane.xlu1 %2068  ;;  %v2123_v59 = vsel %vm2122_vm6, %v2101_v25, %v2121_v23 }
0x172f   :  { %v2066_v2 = vpop.xlane.xlu0 %2065  ;;  %v2109_v61 = vrot.slane %v2069_v56, %v3875_v12 }
0x1730   :  { %v2105_v24 = vrot.slane %v2066_v2, %v3875_v12 }
0x1732   :  { %v2125_v28 = vsel %vm2124_vm7, %v2105_v24, %v2123_v59 }
0x1733   :  { %v2075_v22 = vpop.xlane.xlu1 %2074  ;;  %v2127_v45 = vsel %vm2126_vm8, %v2109_v61, %v2125_v28 }
0x1734   :  { %v2117_v39 = vrot.slane %v2075_v22, %v3875_v12 }
0x1735   :  { %v2072_v38 = vpop.xlane.xlu0 %2071 }
0x1736   :  { %v2113_v35 = vrot.slane %v2072_v38, %v3875_v12 }
0x1738   :  { %v2129_v41 = vsel %vm2128_vm9, %v2113_v35, %v2127_v45 }
0x1739   :  { %v2131_v46 = vsel %vm2130_vm10, %v2117_v39, %v2129_v41 }
0x173a   :  { %v2134_v54 = vsel %vm2133_vm11, %v2131_v46, -inf }
0x173b   :  { %2135 = vmax.xlane.f32.xlu0 %v2134_v54 }
0x17c4   :  { %v2136_v55 = vpop.xlane.xlu0 %2135 }
0x17c5   :  { %v2141_v58 = vrot.slane %v2136_v55, %v3436_v27  ;;  %v2145_v50 = vrot.slane %v2136_v55, %v3442_v29  ;;  %v2149_v60 = vrot.slane %v2136_v55, %v3894_v51  ;;  %v2153_v62 = vrot.slane %v2136_v55, %v3897_v53 }
0x17c6   :  { %v2157_v8 = vrot.slane %v2136_v55, %v3903_v4  ;;  %v2161_v17 = vrot.slane %v2136_v55, %v3907_v44  ;;  %v2165_v7 = vrot.slane %v2136_v55, %v3911_v11  ;;  %v2169_v49 = vrot.slane %v2136_v55, %v3915_v5 }
0x17c7   :  { %v2178_v1 = vsub.f32 %v2054_v9, %v2141_v58  ;;  %v2179_v37 = vsub.f32 %v2057_v63, %v2145_v50  ;;  %v2180_v3 = vsub.f32 %v2060_v15, %v2149_v60  ;;  %v2181_v10 = vsub.f32 %v2063_v14, %v2153_v62 }
0x17c8   :  { %v2182_v40 = vsub.f32 %v2066_v2, %v2157_v8  ;;  %v2183_v13 = vsub.f32 %v2069_v56, %v2161_v17  ;;  %v2184_v63 = vsub.f32 %v2072_v38, %v2165_v7  ;;  %v2185_v42 = vsub.f32 %v2075_v22, %v2169_v49 }
0x17c9   :  { %v2186_v57 = vmul.f32 1.442695, %v2178_v1  ;;  %v2188_v6 = vmul.f32 1.442695, %v2179_v37  ;;  %v2190_v16 = vmul.f32 1.442695, %v2180_v3 }
0x17ca   :  { %v2192_v19 = vmul.f32 1.442695, %v2181_v10  ;;  %v2194_v33 = vmul.f32 1.442695, %v2182_v40  ;;  %v2196_v9 = vmul.f32 1.442695, %v2183_v13 }
0x17cb   :  { %3153 = vpow2.f32 %v2186_v57  ;;  %v2198_v18 = vmul.f32 1.442695, %v2184_v63  ;;  %v2200_v26 = vmul.f32 1.442695, %v2185_v42 }
0x17cc   :  { %3155 = vpow2.f32 %v2188_v6 }
0x17cd   :  { %3157 = vpow2.f32 %v2190_v16 }
0x17ce   :  { %3159 = vpow2.f32 %v2192_v19 }
0x17cf   :  { %3161 = vpow2.f32 %v2194_v33 }
0x17d0   :  { %3163 = vpow2.f32 %v2196_v9 }
0x17d1   :  { %3165 = vpow2.f32 %v2198_v18 }
0x17d2   :  { %3167 = vpow2.f32 %v2200_v26 }
0x17d8   :  { %v3154_v14 = vpop.eup %3153 }
0x17d9   :  { %v3156_v15 = vpop.eup %3155  ;;  %2211 = vperm.xlu1 %3007, %v3154_v14  }
0x17da   :  { %2214 = vperm.xlu0 %3008, %v3156_v15   ;;  %v3158_v20 = vpop.eup %3157 }
0x17db   :  { %v3919_v21 = vpop.eup %3159 }
0x17dc   :  { %v3922_v56 = vpop.eup %3161 }
0x17dd   :  { %2217 = vperm.xlu1 %3007, %v3158_v20   ;;  %v3925_v25 = vpop.eup %3163 }
0x17de   :  { %v3928_v2 = vpop.eup %3165 }
0x17df   :  { %v3931_v23 = vpop.eup %3167 }
0x17e1   :  { %2220 = vperm.xlu1 %3007, %v3919_v21  }
0x17e5   :  { %2223 = vperm.xlu1 %3007, %v3922_v56  }
0x17e9   :  { %2226 = vperm.xlu1 %3007, %v3925_v25  }
0x17ed   :  { %2229 = vperm.xlu1 %3007, %v3928_v2  }
0x17f1   :  { %2232 = vperm.xlu1 %3007, %v3931_v23  }
0x1854   :  { %v2212_v24 = vpop.permute.xlu1 %2211 }
0x1855   :  { %v2215_v61 = vpop.permute.xlu0 %2214  ;;  %v2237_v39 = vrot.slane %v2212_v24, %v3875_v12 }
0x1856   :  { %v2241_v35 = vrot.slane %v2215_v61, %v3875_v12 }
0x1858   :  { %v2218_v59 = vpop.permute.xlu1 %2217  ;;  %v2266_v48 = vsel %vm2118_vm4, %v2241_v35, %v2237_v39 }
0x1859   :  { %v2245_v45 = vrot.slane %v2218_v59, %v3875_v12 }
0x185b   :  { %v2267_v58 = vsel %vm2120_vm5, %v2245_v45, %v2266_v48 }
0x185c   :  { %v2221_v28 = vpop.permute.xlu1 %2220 }
0x185d   :  { %v2249_v41 = vrot.slane %v2221_v28, %v3875_v12 }
0x185f   :  { %v2268_v60 = vsel %vm2122_vm6, %v2249_v41, %v2267_v58 }
0x1860   :  { %v2224_v22 = vpop.permute.xlu1 %2223 }
0x1861   :  { %v2253_v46 = vrot.slane %v2224_v22, %v3875_v12 }
0x1863   :  { %v2269_v62 = vsel %vm2124_vm7, %v2253_v46, %v2268_v60 }
0x1864   :  { %v2227_v38 = vpop.permute.xlu1 %2226 }
0x1865   :  { %v2257_v55 = vrot.slane %v2227_v38, %v3875_v12 }
0x1867   :  { %v2270_v37 = vsel %vm2126_vm8, %v2257_v55, %v2269_v62 }
0x1868   :  { %v2230_v54 = vpop.permute.xlu1 %2229 }
0x1869   :  { %v2261_v50 = vrot.slane %v2230_v54, %v3875_v12 }
0x186b   :  { %v2271_v57 = vsel %vm2128_vm9, %v2261_v50, %v2270_v37 }
0x186c   :  { %v2233_v1 = vpop.permute.xlu1 %2232 }
0x186d   :  { %v2265_v3 = vrot.slane %v2233_v1, %v3875_v12 }
0x186f   :  { %v2272_v6 = vsel %vm2130_vm10, %v2265_v3, %v2271_v57 }
0x1870   :  { %v2274_v8 = vsel %vm2133_vm11, %v2272_v6, 0.0 }
0x1871   :  { %2275 = vadd.xlane.f32.xlu1 %v2274_v8 }
0x18fa   :  { %v2276_v10 = vpop.xlane.xlu1 %2275 }
0x18fb   :  { %v2281_v16 = vrot.slane %v2276_v10, %v3436_v27  ;;  %v2285_v17 = vrot.slane %v2276_v10, %v3442_v29  ;;  %v2289_v40 = vrot.slane %v2276_v10, %v3894_v51  ;;  %v2293_v19 = vrot.slane %v2276_v10, %v3897_v53 }
0x18fc   :  { %v2297_v7 = vrot.slane %v2276_v10, %v3903_v4  ;;  %v2301_v49 = vrot.slane %v2276_v10, %v3907_v44  ;;  %v2305_v42 = vrot.slane %v2276_v10, %v3911_v11  ;;  %v2309_v26 = vrot.slane %v2276_v10, %v3915_v5 }
0x18fd   :  { %3169 = vrcp.f32 %v2281_v16 }
0x18fe   :  { %3171 = vrcp.f32 %v2285_v17 }
0x18ff   :  { %3173 = vrcp.f32 %v2289_v40 }
0x1900   :  { %3175 = vrcp.f32 %v2293_v19 }
0x1901   :  { %3177 = vrcp.f32 %v2297_v7 }
0x1902   :  { %3179 = vrcp.f32 %v2301_v49 }
0x1903   :  { %3181 = vrcp.f32 %v2305_v42 }
0x1904   :  { %3183 = vrcp.f32 %v2309_v26 }
0x190a   :  { %v3170_v13 = vpop.eup %3169 }
0x190b   :  { %v2319_v33 = vmul.f32 %v3170_v13, %v3154_v14  ;;  %v3172_v63 = vpop.eup %3171  ;;  %v2524_v13 = vld [vmem:[%s4047_s7 + $0x38] sm:$0xff] }
0x190c   :  { %v2321_v9 = vmul.f32 %v3172_v63, %v3156_v15  ;;  %v3174_v18 = vpop.eup %3173  ;;  %2980 = vmatpush3.msra.mxu1 %v2524_v13  ;;  %v2518_v63 = vld [vmem:[%s4047_s7 + $0x8] sm:$0xff] }
0x190d   :  { %2343 = vperm.xlu0 %3008, %v2319_v33   ;;  %v2323_v24 = vmul.f32 %v3174_v18, %v3158_v20  ;;  %v3176_v59 = vpop.eup %3175  ;;  %2981 = vmatprep.subr.mxu1 %v3237_v0  ;;  %v2520_v33 = vld [vmem:[%s4047_s7 + $0x18] sm:$0xff] }
0x190e   :  { %v2325_v14 = vmul.f32 %v3176_v59, %v3919_v21  ;;  %v3178_v28 = vpop.eup %3177 }
0x190f   :  { %v2327_v22 = vmul.f32 %v3178_v28, %v3922_v56  ;;  %v3180_v61 = vpop.eup %3179 }
0x1910   :  { %v2329_v15 = vmul.f32 %v3180_v61, %v3925_v25  ;;  %v3182_v38 = vpop.eup %3181 }
0x1911   :  { %2346 = vperm.xlu0 %3008, %v2321_v9   ;;  %v2331_v35 = vmul.f32 %v3182_v38, %v3928_v2  ;;  %v3184_v39 = vpop.eup %3183  ;;  %v2517_v9 = vld [vmem:[%s4047_s7] sm:$0xff] }
0x1912   :  { %v2333_v20 = vmul.f32 %v3184_v39, %v3931_v23 }
0x1915   :  { %2349 = vperm.xlu0 %3008, %v2323_v24  }
0x1919   :  { %2352 = vperm.xlu0 %3008, %v2325_v14  }
0x191d   :  { %2355 = vperm.xlu0 %3008, %v2327_v22  }
0x1921   :  { %2358 = vperm.xlu0 %3008, %v2329_v15  }
0x1925   :  { %2361 = vperm.xlu0 %3008, %v2331_v35  }
0x1929   :  { %2364 = vperm.xlu0 %3008, %v2333_v20  }
0x1988   :  { %v2344_v45 = vpop.permute.xlu0 %2343 }
0x1989   :  { %v2369_v25 = vrot.slane %v2344_v45, %v3875_v12 }
0x198c   :  { %v2347_v41 = vpop.permute.xlu0 %2346 }
0x198d   :  { %v2373_v56 = vrot.slane %v2347_v41, %v3875_v12 }
0x198f   :  { %v2398_v23 = vsel %vm2118_vm4, %v2373_v56, %v2369_v25 }
0x1990   :  { %v2350_v21 = vpop.permute.xlu0 %2349 }
0x1991   :  { %v2377_v55 = vrot.slane %v2350_v21, %v3875_v12 }
0x1993   :  { %v2399_v62 = vsel %vm2120_vm5, %v2377_v55, %v2398_v23 }
0x1994   :  { %v2353_v46 = vpop.permute.xlu0 %2352 }
0x1995   :  { %v2381_v58 = vrot.slane %v2353_v46, %v3875_v12 }
0x1997   :  { %v2400_v37 = vsel %vm2122_vm6, %v2381_v58, %v2399_v62  ;;  %v2668_v58 = vld [vmem:[%s4048_s8] ss:$0 sm:$0xff] }
0x1998   :  { %v2356_v54 = vpop.permute.xlu0 %2355 }
0x1999   :  { %v2385_v2 = vrot.slane %v2356_v54, %v3875_v12 }
0x199b   :  { %v2401_v3 = vsel %vm2124_vm7, %v2385_v2, %v2400_v37 }
0x199c   :  { %v2359_v48 = vpop.permute.xlu0 %2358 }
0x199d   :  { %v2389_v60 = vrot.slane %v2359_v48, %v3875_v12 }
0x199f   :  { %v2402_v6 = vsel %vm2126_vm8, %v2389_v60, %v2401_v3 }
0x19a0   :  { %v2362_v50 = vpop.permute.xlu0 %2361 }
0x19a1   :  { %v2393_v1 = vrot.slane %v2362_v50, %v3875_v12 }
0x19a3   :  { %v2403_v10 = vsel %vm2128_vm9, %v2393_v1, %v2402_v6 }
0x19a4   :  { %v2365_v57 = vpop.permute.xlu0 %2364 }
0x19a5   :  { %v2397_v8 = vrot.slane %v2365_v57, %v3875_v12 }
0x19a7   :  { %v2404_v16 = vsel %vm2130_vm10, %v2397_v8, %v2403_v10 }
0x19a8   :  { %2406 = vxpose.xlu1.b32.start.end [1/1] (short) (narrow) %v2404_v16, 8 }
0x1a24   :  { %v2422_v17 = vpop.trf.xlu1 }
0x1a25   :  { %v2441_v40 = vrot.slane %v2422_v17, %v3436_v27  ;;  %v2448_v19 = vrot.slane %v2422_v17, %v3442_v29  ;;  %v2455_v7 = vrot.slane %v2422_v17, %v3894_v51  ;;  %v2462_v12 = vrot.slane %v2422_v17, %v3897_v53  ;;  %v2523_v27 = vld [vmem:[%s4047_s7 + $0x30] sm:$0xff]  ;;  %v2522_v29 = vld [vmem:[%s4047_s7 + $0x28] sm:$0xff]  ;;  %v2521_v53 = vld [vmem:[%s4047_s7 + $0x20] sm:$0xff] }
0x1a26   :  { %2982 = vmatpush3.msra.mxu1 %v2523_v27  ;;  %v2469_v51 = vrot.slane %v2422_v17, %v3903_v4  ;;  %v2476_v49 = vrot.slane %v2422_v17, %v3907_v44  ;;  %v2519_v4 = vld [vmem:[%s4047_s7 + $0x10] sm:$0xff]  ;;  %v2483_v44 = vrot.slane %v2422_v17, %v3911_v11  ;;  %v2490_v42 = vrot.slane %v2422_v17, %v3915_v5 }
0x1a27   :  { %2443 = vbcast.lane.b32.xlu0 %v2441_v40, 256  ;;  %2983 = vmatprep.subr.mxu1 %v3237_v0 }
0x1a28   :  { %2984 = vmatpush3.msra.mxu1 %v2522_v29 }
0x1a29   :  { %2985 = vmatprep.subr.mxu1 %v3237_v0 }
0x1a2a   :  { %2986 = vmatpush3.msra.mxu1 %v2521_v53 }
0x1a2b   :  { %2450 = vbcast.lane.b32.xlu0 %v2448_v19, 256  ;;  %2987 = vmatprep.subr.mxu1 %v3237_v0 }
0x1a2c   :  { %2988 = vmatpush3.msra.mxu1 %v2520_v33 }
0x1a2d   :  { %2989 = vmatprep.subr.mxu1 %v3237_v0 }
0x1a2e   :  { %2990 = vmatpush3.msra.mxu1 %v2519_v4 }
0x1a2f   :  { %2457 = vbcast.lane.b32.xlu0 %v2455_v7, 256  ;;  %2991 = vmatprep.subr.mxu1 %v3237_v0 }
0x1a30   :  { %2992 = vmatpush3.msra.mxu1 %v2518_v63 }
0x1a31   :  { %2993 = vmatprep.subr.mxu1 %v3237_v0 }
0x1a32   :  { %2994 = vmatpush3.msra.mxu1 %v2517_v9 }
0x1a33   :  { %2464 = vbcast.lane.b32.xlu0 %v2462_v12, 256 }
0x1a37   :  { %2471 = vbcast.lane.b32.xlu0 %v2469_v51, 256 }
0x1a3b   :  { %2478 = vbcast.lane.b32.xlu0 %v2476_v49, 256 }
0x1a3f   :  { %2485 = vbcast.lane.b32.xlu0 %v2483_v44, 256 }
0x1a43   :  { %2492 = vbcast.lane.b32.xlu0 %v2490_v42, 256 }
0x1a99   :  { %v2444_v18 = vpop.permute.xlu0 %2443 }
0x1a9a   :  { %v2494_v28 = vmul.f32 %v2444_v18, %v3823_v31 }
0x1a9c   :  { %v2502_v15 = vsel %vm1899_vm3, %v2494_v28, 0.0 }
0x1a9d   :  { %v2451_v26 = vpop.permute.xlu0 %2450 }
0x1a9e   :  { %v2495_v14 = vmul.f32 %v2451_v26, %v3828_v43 }
0x1aa0   :  { %v2503_v11 = vsel %vm1899_vm3, %v2495_v14, 0.0 }
0x1aa1   :  { %v2458_v24 = vpop.permute.xlu0 %2457  ;;  %v2504_v35 = vadd.f32 %v2503_v11, %v2502_v15 }
0x1aa2   :  { %v2496_v22 = vmul.f32 %v2458_v24, %v3834_v52 }
0x1aa4   :  { %v2505_v5 = vsel %vm1899_vm3, %v2496_v22, 0.0 }
0x1aa5   :  { %v2465_v59 = vpop.permute.xlu0 %2464  ;;  %v2506_v31 = vadd.f32 %v2505_v5, %v2504_v35 }
0x1aa6   :  { %v2497_v0 = vmul.f32 %v2465_v59, %v3839_v30 }
0x1aa8   :  { %v2507_v20 = vsel %vm1899_vm3, %v2497_v0, 0.0 }
0x1aa9   :  { %v2472_v61 = vpop.permute.xlu0 %2471  ;;  %v2508_v45 = vadd.f32 %v2507_v20, %v2506_v31 }
0x1aaa   :  { %v2498_v38 = vmul.f32 %v2472_v61, %v3846_v32 }
0x1aac   :  { %v2509_v52 = vsel %vm1899_vm3, %v2498_v38, 0.0 }
0x1aad   :  { %v2479_v39 = vpop.permute.xlu0 %2478  ;;  %v2510_v46 = vadd.f32 %v2509_v52, %v2508_v45 }
0x1aae   :  { %v2499_v43 = vmul.f32 %v2479_v39, %v3850_v47 }
0x1ab0   :  { %v2511_v21 = vsel %vm1899_vm3, %v2499_v43, 0.0 }
0x1ab1   :  { %v2486_v41 = vpop.permute.xlu0 %2485  ;;  %v2512_v48 = vadd.f32 %v2511_v21, %v2510_v46 }
0x1ab2   :  { %v2500_v30 = vmul.f32 %v2486_v41, %v3854_v36 }
0x1ab4   :  { %v2513_v54 = vsel %vm1899_vm3, %v2500_v30, 0.0 }
0x1ab5   :  { %v2493_v32 = vpop.permute.xlu0 %2492  ;;  %v2514_v55 = vadd.f32 %v2513_v54, %v2512_v48 }
0x1ab6   :  { %v2501_v56 = vmul.f32 %v2493_v32, %v3858_v34 }
0x1ab8   :  { %v2515_v25 = vsel %vm1899_vm3, %v2501_v56, 0.0 }
0x1ab9   :  { %v2516_v47 = vadd.f32 %v2515_v25, %v2514_v55 }
0x1abb   :  { %2996 = vmatmul.mubr.msk.f32.vlgmr.msra.gmra.mxu1 %vm1899_vm3, %v2516_v47 }
0x1b7b   :  { %v2601_v36 = vpop.f32.mrf.mxu1 }
0x1b7c   :  { %v2602_v2 = vadd.f32 %v2668_v58, %v2601_v36 }
0x1b7d   :  { %v2997_v50 = vpop.f32.mrf.mxu1 }
0x1b7e   :  { %2605 = vst [vmem:[#allocation7] sm:$0xff] %v2602_v2 }
0x1b7f   :  { %3221 = shalt.err (!%p3218_p9)
}
0x1b80   :  { %2615 = dma.vmem_to_hbm [thread:$0]  %s2613_s26, 128, %s4049_s9, [#allocation6]  }
0x1b81   :  { %3232 = dma.done.wait [#allocation6], 128  }
0x1b82   :  { %3233 = vsyncadd [#allocation6], 4294967168 }
0x1b83   :  { %2619 = vsyncpa [#allocation5], 1 }
0x1b84   :  { %2620 = vsyncpa [#allocation6], 1 }

</bundles_post_ra>
